<compile_context>
chip_gen: v6e
topology: v6e:2x2x1
jax: 0.10.0
libtpu: 0.0.40
codegen_flags: <defaults>
</compile_context>

<pallas_src>
import functools

import jax
import jax.numpy as jnp
from jax import lax
from jax.experimental import pallas as pl
from jax.experimental.pallas import tpu as pltpu


def global_block_kernel(x_ref, gamma_ref, beta_ref, wqkv_ref, wproj_ref,
                        bproj_ref, out_ref, o_scratch, *, num_heads, eps):
    """One batch tile per grid step.

    x_ref     : (Bt, N, C)     input tokens (f32)
    gamma_ref : (1, C)         LayerNorm weight (f32)
    beta_ref  : (1, C)         LayerNorm bias   (f32)
    wqkv_ref  : (H, C, 3*hd)   per-head packed [Wq*scale | Wk | Wv] (bf16)
    wproj_ref : (C, C)         output projection, concat-heads layout (bf16)
    bproj_ref : (1, C)         output projection bias (f32)
    out_ref   : (Bt, N, C)     result
    o_scratch : (Bt*N, C)      bf16 concat-heads attention-output scratch
    """
    Bt, N, C = x_ref.shape
    hd = C // num_heads
    rows = Bt * N

    x = x_ref[...]
    x2 = x.reshape(rows, C)                              # merge leading dims (cheap)

    # ---- LayerNorm over the last dim (f32 statistics) -----------------------
    mean = jnp.mean(x2, axis=-1, keepdims=True)
    xc = x2 - mean
    var = jnp.mean(xc * xc, axis=-1, keepdims=True)
    inv = lax.rsqrt(var + eps)
    xn_bf = (xc * inv * gamma_ref[...] + beta_ref[...]).astype(jnp.bfloat16)

    # ---- Per-head attention -> concat-heads scratch --------------------------
    # Static loop: num_heads is small, so the weight-ref index and the scratch
    # column slice are static.  Each head's (Bt, N, N) working set dies at the
    # scratch store, so only one head's scores/probs stay live at a time.
    for h in range(num_heads):
        w_h = wqkv_ref[h]                                            # (C, 3*hd) bf16
        qkv = jnp.dot(xn_bf, w_h,
                      preferred_element_type=jnp.float32)            # (rows, 3*hd) f32
        # `scale` is folded into Wq wrapper-side, so q is already scaled.
        q = qkv[:, 0 * hd:1 * hd].astype(jnp.bfloat16).reshape(Bt, N, hd)
        k = qkv[:, 1 * hd:2 * hd].astype(jnp.bfloat16).reshape(Bt, N, hd)
        v = qkv[:, 2 * hd:3 * hd].astype(jnp.bfloat16).reshape(Bt, N, hd)

        # scores: contract on hd for both operands (no materialized k.T)
        s = jnp.einsum('bnd,bmd->bnm', q, k,
                       preferred_element_type=jnp.float32)           # (Bt, N, N) f32

        # softmax in f32; denominator via EUP approx reciprocal
        m = jnp.max(s, axis=-1, keepdims=True)
        p = jnp.exp(s - m)
        p = p * pl.reciprocal(jnp.sum(p, axis=-1, keepdims=True), approx=True)

        o = jnp.einsum('bnm,bmd->bnd', p.astype(jnp.bfloat16), v,
                       preferred_element_type=jnp.float32)           # (Bt, N, hd) f32
        o_scratch[:, h * hd:(h + 1) * hd] = (
            o.reshape(rows, hd).astype(jnp.bfloat16))

    # ---- Single K=C output projection over the concatenated heads ------------
    proj = jnp.dot(o_scratch[...], wproj_ref[...],
                   preferred_element_type=jnp.float32)               # (rows, C) f32

    # ---- Bias + residual ------------------------------------------------------
    out = x2 + proj + bproj_ref[...]
    out_ref[...] = out.reshape(Bt, N, C).astype(out_ref.dtype)


def _vmem_capacity_bytes():
    """Per-core VMEM capacity; conservative fallback if the query is unavailable."""
    try:
        return int(pltpu.get_tpu_info().vmem_capacity_bytes)
    except Exception:
        return 64 * 1024 * 1024            # v7x-sized fallback (smallest current gen)


def _vmem_footprint(bt, N, C, num_heads, x_itemsize):
    """Rough bytes resident in VMEM for one grid step with batch-tile bt."""
    rows = bt * N
    hd = C // num_heads
    io = 2 * 2 * rows * C * x_itemsize          # double-buffered x-in + out blocks
    weights = 8 * C * C                         # bf16 Wqkv (6C^2 B) + Wproj (2C^2 B)
    scratch = rows * C * 2                      # bf16 concat-heads scratch
    lnorm = rows * C * (4 + 2)                  # xn f32 + bf16 copy
    perhead = rows * 3 * hd * (4 + 2)           # one head's qkv (f32 + bf16 casts)
    scores = 2 * bt * N * N * 4                 # s + p (f32), one head live
    proj = rows * C * 4                         # f32 projection / residual temp
    return io + weights + scratch + lnorm + perhead + scores + proj


def _pick_block_b(B, N, C, num_heads, x_itemsize, budget_bytes):
    """Batch tile: largest divisor of B fitting the VMEM budget, keeping the grid
    >= 2 steps (megacore / pipelining) and preferring Bt*N >= 256 MXU rows."""
    divisors = [d for d in range(1, B + 1) if B % d == 0]
    min_steps = 1 if B == 1 else 2
    feasible = [d for d in divisors
                if B // d >= min_steps
                and _vmem_footprint(d, N, C, num_heads, x_itemsize) <= budget_bytes]
    if not feasible:
        return 1
    good = [d for d in feasible if d * N >= 256]
    # Smallest tile that already fills the MXU M-dim keeps the most grid steps
    # (better pipelining / core sharding); otherwise take the largest fit.
    return min(good) if good else max(feasible)


def global_forward(x, params, *, num_heads, eps=1e-5, qk_scale=None, block_b=None):
    """x: (B, N, C) float32.

    params:
      ln_gamma (1, C), ln_beta (1, C)   LayerNorm affine
      wqkv     (C, 3C)                  QKV projection, pre-transposed (out = x @ W)
      wproj    (C, C)                   output projection, pre-transposed
      bproj    (1, C)                   output projection bias
    """
    B, N, C = x.shape
    assert C % num_heads == 0, "C must be divisible by num_heads"
    hd = C // num_heads
    scale = float(qk_scale) if qk_scale is not None else float(hd) ** -0.5

    # ---- Wrapper-side weight re-layout (one-time, outside the kernel) --------
    # wqkv columns are ordered (3, H, hd) exactly as in the PyTorch reshape.
    Wqkv = params["wqkv"].reshape(C, 3, num_heads, hd)
    wq = Wqkv[:, 0] * scale                      # fold qk scale into Wq
    wk = Wqkv[:, 1]
    wv = Wqkv[:, 2]
    # (H, C, 3*hd): per-head [q | k | v] -> one lane-dense matmul per head.
    wqkv_h = jnp.transpose(
        jnp.concatenate([wq, wk, wv], axis=-1), (1, 0, 2)).astype(jnp.bfloat16)
    wproj = params["wproj"].astype(jnp.bfloat16)                    # (C, C)

    gamma = params["ln_gamma"].reshape(1, C).astype(jnp.float32)
    beta = params["ln_beta"].reshape(1, C).astype(jnp.float32)
    bproj = params["bproj"].reshape(1, C).astype(jnp.float32)

    vmem_cap = _vmem_capacity_bytes()
    vmem_limit = min(int(vmem_cap * 0.75), 112 * 1024 * 1024)
    if block_b is None:
        block_b = _pick_block_b(B, N, C, num_heads, x.dtype.itemsize,
                                budget_bytes=int(vmem_limit * 0.85))
    assert B % block_b == 0
    grid = (B // block_b,)
    rows = block_b * N

    kernel = functools.partial(global_block_kernel, num_heads=num_heads, eps=eps)

    # Advisory cost estimate (QKV + scores + attn@V + output projection).
    flops = int(8 * B * N * C * C + 4 * B * N * N * C)
    transcendentals = int(B * num_heads * N * N)
    bytes_accessed = int(2 * B * N * C * 4 + 8 * C * C + 3 * C * 4)
    cost = pl.CostEstimate(flops=flops, transcendentals=transcendentals,
                           bytes_accessed=bytes_accessed)

    # TODO(synk): for long sequences (N >= ~1024 on v7x, ~2048 on v5e/v6e) switch
    # the per-head attention to a KV-tiled flash-style inner loop instead of
    # materializing the (Bt, N, N) scores, and bound the head-loop unrolling.

    def call(single_buffer_weights):
        if single_buffer_weights:
            # Constant index maps -> never re-fetched; single-buffering reclaims
            # ~8*C^2 bytes of VMEM headroom (matters most on v7x's 64 MiB VMEM).
            wqkv_spec = pl.BlockSpec((num_heads, C, 3 * hd), lambda b: (0, 0, 0),
                                     pipeline_mode=pl.Buffered(1))
            wproj_spec = pl.BlockSpec((C, C), lambda b: (0, 0),
                                      pipeline_mode=pl.Buffered(1))
        else:
            wqkv_spec = pl.BlockSpec((num_heads, C, 3 * hd), lambda b: (0, 0, 0))
            wproj_spec = pl.BlockSpec((C, C), lambda b: (0, 0))

        return pl.pallas_call(
            kernel,
            out_shape=jax.ShapeDtypeStruct((B, N, C), x.dtype),
            grid_spec=pltpu.PrefetchScalarGridSpec(
                num_scalar_prefetch=0,
                grid=grid,
                in_specs=[
                    pl.BlockSpec((block_b, N, C), lambda b: (b, 0, 0)),   # x
                    pl.BlockSpec((1, C), lambda b: (0, 0)),               # gamma
                    pl.BlockSpec((1, C), lambda b: (0, 0)),               # beta
                    wqkv_spec,                                            # Wqkv packed
                    wproj_spec,                                           # Wproj
                    pl.BlockSpec((1, C), lambda b: (0, 0)),               # bproj
                ],
                out_specs=pl.BlockSpec((block_b, N, C), lambda b: (b, 0, 0)),
                scratch_shapes=[pltpu.VMEM((rows, C), jnp.bfloat16)],
            ),
            compiler_params=pltpu.CompilerParams(
                dimension_semantics=("parallel",),
                vmem_limit_bytes=vmem_limit,
            ),
            cost_estimate=cost,
        )(x, gamma, beta, wqkv_h, wproj, bproj)

    try:
        return call(single_buffer_weights=True)
    except Exception:
        # Some Pallas versions reject Buffered(1); fall back to default buffering.
        return call(single_buffer_weights=False)


def reference_forward(x, params, *, num_heads, eps=1e-5, qk_scale=None):
    """Pure-JAX f32 reference (mirrors the PyTorch semantics) for validation."""
    B, N, C = x.shape
    hd = C // num_heads
    scale = float(qk_scale) if qk_scale is not None else hd ** -0.5
    mean = jnp.mean(x, axis=-1, keepdims=True)
    var = jnp.mean((x - mean) ** 2, axis=-1, keepdims=True)
    xn = (x - mean) / jnp.sqrt(var + eps) * params["ln_gamma"][0] + params["ln_beta"][0]
    qkv = xn @ params["wqkv"]                                   # (B, N, 3C)
    qkv = qkv.reshape(B, N, 3, num_heads, hd).transpose(2, 0, 3, 1, 4)
    q, k, v = qkv[0], qkv[1], qkv[2]                            # (B, H, N, hd)
    attn = jax.nn.softmax((q @ k.transpose(0, 1, 3, 2)) * scale, axis=-1)
    out = (attn @ v).transpose(0, 2, 1, 3).reshape(B, N, C)
    out = out @ params["wproj"] + params["bproj"][0]
    return x + out


if __name__ == "__main__":
    # Small shapes consistent with the module: dim=32, num_heads=4, seq=8, batch=2
    B, N, C = 2, 8, 32
    num_heads = 4

    key = jax.random.PRNGKey(0)
    kx, k1, k2, k3 = jax.random.split(key, 4)

    x = jax.random.normal(kx, (B, N, C), dtype=jnp.float32)

    # Deterministic synthetic parameters (PyTorch shapes, pre-transposed for x @ W).
    params = {
        "ln_gamma": jnp.ones((1, C), jnp.float32),
        "ln_beta": jnp.zeros((1, C), jnp.float32),
        # nn.Linear(dim, dim*3, bias=False): weight (3C, C) -> transpose to (C, 3C)
        "wqkv": (jax.random.normal(k1, (3 * C, C), jnp.float32) * 0.05).T,
        # nn.Linear(dim, dim): weight (C, C) -> transpose; bias (C,)
        "wproj": (jax.random.normal(k2, (C, C), jnp.float32) * 0.05).T,
        "bproj": (jax.random.normal(k3, (1, C), jnp.float32) * 0.01),
    }

    out = global_forward(x, params, num_heads=num_heads)
    out = jax.block_until_ready(out)

    ref = reference_forward(x, params, num_heads=num_heads)
    assert out.shape == (B, N, C)
    # bf16 matmul operands (f32 accumulation) + approx reciprocal -> bf16 tolerance.
    assert jnp.allclose(out, ref, atol=2e-2, rtol=2e-2), "mismatch vs reference"

    print("KERNEL_OK")
</pallas_src>

<mosaic_0001>
module attributes {stable_mosaic.version = 11 : i64} {
  func.func @global_block_kernel(%arg0: i32, %arg1: memref<1x8x32xf32, #tpu.memory_space<vmem>>, %arg2: memref<1x32xf32, #tpu.memory_space<vmem>>, %arg3: memref<1x32xf32, #tpu.memory_space<vmem>>, %arg4: memref<4x32x24xbf16, #tpu.memory_space<vmem>>, %arg5: memref<32x32xbf16, #tpu.memory_space<vmem>>, %arg6: memref<1x32xf32, #tpu.memory_space<vmem>>, %arg7: memref<1x8x32xf32, #tpu.memory_space<vmem>>, %arg8: memref<8x32xbf16, #tpu.memory_space<vmem>>) attributes {dimension_semantics = [#tpu.dimension_semantics<parallel>], iteration_bounds = array<i64: 2>, scalar_prefetch = 0 : i64, scratch_operands = 1 : i64, tpu.core_type = #tpu.core_type<tc>, window_params = [{transform_indices = @transform_0, window_bounds = array<i64: 1, 8, 32>}, {pipeline_mode = #tpu.pipeline_mode<synchronous>, transform_indices = @transform_1, window_bounds = array<i64: 1, 32>}, {pipeline_mode = #tpu.pipeline_mode<synchronous>, transform_indices = @transform_2, window_bounds = array<i64: 1, 32>}, {pipeline_mode = #tpu.pipeline_mode<synchronous>, transform_indices = @transform_3, window_bounds = array<i64: 4, 32, 24>}, {pipeline_mode = #tpu.pipeline_mode<synchronous>, transform_indices = @transform_4, window_bounds = array<i64: 32, 32>}, {pipeline_mode = #tpu.pipeline_mode<synchronous>, transform_indices = @transform_5, window_bounds = array<i64: 1, 32>}, {transform_indices = @transform_6, window_bounds = array<i64: 1, 8, 32>}]} {
    %c0 = arith.constant 0 : index
    %c0_0 = arith.constant 0 : index
    %c0_1 = arith.constant 0 : index
    %0 = vector.load %arg1[%c0, %c0_0, %c0_1] : memref<1x8x32xf32, #tpu.memory_space<vmem>>, vector<1x8x32xf32>
    %1 = vector.shape_cast %0 : vector<1x8x32xf32> to vector<8x32xf32>
    %cst = arith.constant dense<0.000000e+00> : vector<8xf32>
    %2 = vector.multi_reduction <add>, %1, %cst [1] : vector<8x32xf32> to vector<8xf32>
    %3 = vector.shape_cast %2 : vector<8xf32> to vector<8x1xf32>
    %cst_2 = arith.constant 3.200000e+01 : f32
    %4 = vector.broadcast %cst_2 : f32 to vector<8x1xf32>
    %5 = arith.divf %3, %4 : vector<8x1xf32>
    %6 = vector.broadcast %5 : vector<8x1xf32> to vector<8x32xf32>
    %7 = arith.subf %1, %6 : vector<8x32xf32>
    %8 = arith.mulf %7, %7 : vector<8x32xf32>
    %cst_3 = arith.constant dense<0.000000e+00> : vector<8xf32>
    %9 = vector.multi_reduction <add>, %8, %cst_3 [1] : vector<8x32xf32> to vector<8xf32>
    %10 = vector.shape_cast %9 : vector<8xf32> to vector<8x1xf32>
    %cst_4 = arith.constant 3.200000e+01 : f32
    %11 = vector.broadcast %cst_4 : f32 to vector<8x1xf32>
    %12 = arith.divf %10, %11 : vector<8x1xf32>
    %cst_5 = arith.constant 9.99999974E-6 : f32
    %13 = vector.broadcast %cst_5 : f32 to vector<8x1xf32>
    %14 = arith.addf %12, %13 : vector<8x1xf32>
    %15 = math.rsqrt %14 : vector<8x1xf32>
    %16 = vector.broadcast %15 : vector<8x1xf32> to vector<8x32xf32>
    %17 = arith.mulf %7, %16 : vector<8x32xf32>
    %c0_6 = arith.constant 0 : index
    %c0_7 = arith.constant 0 : index
    %18 = vector.load %arg2[%c0_6, %c0_7] : memref<1x32xf32, #tpu.memory_space<vmem>>, vector<1x32xf32>
    %19 = vector.broadcast %18 : vector<1x32xf32> to vector<8x32xf32>
    %20 = arith.mulf %17, %19 : vector<8x32xf32>
    %c0_8 = arith.constant 0 : index
    %c0_9 = arith.constant 0 : index
    %21 = vector.load %arg3[%c0_8, %c0_9] : memref<1x32xf32, #tpu.memory_space<vmem>>, vector<1x32xf32>
    %22 = vector.broadcast %21 : vector<1x32xf32> to vector<8x32xf32>
    %23 = arith.addf %20, %22 : vector<8x32xf32>
    %24 = arith.truncf %23 : vector<8x32xf32> to vector<8x32xbf16>
    %c0_10 = arith.constant 0 : index
    %c0_11 = arith.constant 0 : index
    %c0_12 = arith.constant 0 : index
    %25 = vector.load %arg4[%c0_10, %c0_11, %c0_12] : memref<4x32x24xbf16, #tpu.memory_space<vmem>>, vector<1x32x24xbf16>
    %26 = vector.shape_cast %25 : vector<1x32x24xbf16> to vector<32x24xbf16>
    %cst_13 = arith.constant dense<0.000000e+00> : vector<8x24xf32>
    %27 = tpu.matmul %24, %26, %cst_13 {dimension_numbers = #tpu.dot_dimension_numbers<[1], [0], [0], [1], [0, 0, 1, 1], [], []>} : vector<8x32xbf16>, vector<32x24xbf16>, vector<8x24xf32> -> vector<8x24xf32>
    %28 = vector.extract_strided_slice %27 {offsets = [0, 0], sizes = [8, 8], strides = [1, 1]} : vector<8x24xf32> to vector<8x8xf32>
    %29 = arith.truncf %28 : vector<8x8xf32> to vector<8x8xbf16>
    %30 = vector.shape_cast %29 : vector<8x8xbf16> to vector<1x8x8xbf16>
    %31 = vector.extract_strided_slice %27 {offsets = [0, 8], sizes = [8, 8], strides = [1, 1]} : vector<8x24xf32> to vector<8x8xf32>
    %32 = arith.truncf %31 : vector<8x8xf32> to vector<8x8xbf16>
    %33 = vector.shape_cast %32 : vector<8x8xbf16> to vector<1x8x8xbf16>
    %34 = vector.extract_strided_slice %27 {offsets = [0, 16], sizes = [8, 8], strides = [1, 1]} : vector<8x24xf32> to vector<8x8xf32>
    %35 = arith.truncf %34 : vector<8x8xf32> to vector<8x8xbf16>
    %36 = vector.shape_cast %35 : vector<8x8xbf16> to vector<1x8x8xbf16>
    "tpu.trace_start"() <{level = 10 : i32, message = "bnd,bmd->bnm"}> : () -> ()
    %cst_14 = arith.constant dense<0.000000e+00> : vector<1x8x8xf32>
    %37 = tpu.matmul %30, %33, %cst_14 {dimension_numbers = #tpu.dot_dimension_numbers<[2], [2], [1], [1], [0, 0, 0, 1, 1, 1], [0], [0]>} : vector<1x8x8xbf16>, vector<1x8x8xbf16>, vector<1x8x8xf32> -> vector<1x8x8xf32>
    "tpu.trace_stop"() : () -> ()
    %cst_15 = arith.constant dense<0xFF800000> : vector<1x8xf32>
    %38 = vector.multi_reduction <maximumf>, %37, %cst_15 [2] : vector<1x8x8xf32> to vector<1x8xf32>
    %39 = vector.shape_cast %38 : vector<1x8xf32> to vector<1x8x1xf32>
    %40 = vector.broadcast %39 : vector<1x8x1xf32> to vector<1x8x8xf32>
    %41 = arith.subf %37, %40 : vector<1x8x8xf32>
    %42 = math.exp %41 : vector<1x8x8xf32>
    %cst_16 = arith.constant dense<0.000000e+00> : vector<1x8xf32>
    %43 = vector.multi_reduction <add>, %42, %cst_16 [2] : vector<1x8x8xf32> to vector<1x8xf32>
    %44 = vector.shape_cast %43 : vector<1x8xf32> to vector<1x8x1xf32>
    %45 = tpu.reciprocal %44 {approx = true} : vector<1x8x1xf32> -> vector<1x8x1xf32>
    %46 = vector.broadcast %45 : vector<1x8x1xf32> to vector<1x8x8xf32>
    %47 = arith.mulf %42, %46 : vector<1x8x8xf32>
    %48 = arith.truncf %47 : vector<1x8x8xf32> to vector<1x8x8xbf16>
    "tpu.trace_start"() <{level = 10 : i32, message = "bnm,bmd->bnd"}> : () -> ()
    %cst_17 = arith.constant dense<0.000000e+00> : vector<1x8x8xf32>
    %49 = tpu.matmul %48, %36, %cst_17 {dimension_numbers = #tpu.dot_dimension_numbers<[2], [1], [1], [2], [0, 0, 0, 1, 1, 2], [0], [0]>} : vector<1x8x8xbf16>, vector<1x8x8xbf16>, vector<1x8x8xf32> -> vector<1x8x8xf32>
    "tpu.trace_stop"() : () -> ()
    %50 = vector.shape_cast %49 : vector<1x8x8xf32> to vector<8x8xf32>
    %51 = arith.truncf %50 : vector<8x8xf32> to vector<8x8xbf16>
    %c0_18 = arith.constant 0 : index
    %c0_19 = arith.constant 0 : index
    %52 = vector.load %arg8[%c0_18, %c0_19] : memref<8x32xbf16, #tpu.memory_space<vmem>>, vector<8x8xbf16>
    tpu.vector_store %arg8[%c0_18, %c0_19], %51 {strides = array<i32>} : memref<8x32xbf16, #tpu.memory_space<vmem>>, vector<8x8xbf16>,
    %c1 = arith.constant 1 : index
    %c0_20 = arith.constant 0 : index
    %c0_21 = arith.constant 0 : index
    %53 = vector.load %arg4[%c1, %c0_20, %c0_21] : memref<4x32x24xbf16, #tpu.memory_space<vmem>>, vector<1x32x24xbf16>
    %54 = vector.shape_cast %53 : vector<1x32x24xbf16> to vector<32x24xbf16>
    %cst_22 = arith.constant dense<0.000000e+00> : vector<8x24xf32>
    %55 = tpu.matmul %24, %54, %cst_22 {dimension_numbers = #tpu.dot_dimension_numbers<[1], [0], [0], [1], [0, 0, 1, 1], [], []>} : vector<8x32xbf16>, vector<32x24xbf16>, vector<8x24xf32> -> vector<8x24xf32>
    %56 = vector.extract_strided_slice %55 {offsets = [0, 0], sizes = [8, 8], strides = [1, 1]} : vector<8x24xf32> to vector<8x8xf32>
    %57 = arith.truncf %56 : vector<8x8xf32> to vector<8x8xbf16>
    %58 = vector.shape_cast %57 : vector<8x8xbf16> to vector<1x8x8xbf16>
    %59 = vector.extract_strided_slice %55 {offsets = [0, 8], sizes = [8, 8], strides = [1, 1]} : vector<8x24xf32> to vector<8x8xf32>
    %60 = arith.truncf %59 : vector<8x8xf32> to vector<8x8xbf16>
    %61 = vector.shape_cast %60 : vector<8x8xbf16> to vector<1x8x8xbf16>
    %62 = vector.extract_strided_slice %55 {offsets = [0, 16], sizes = [8, 8], strides = [1, 1]} : vector<8x24xf32> to vector<8x8xf32>
    %63 = arith.truncf %62 : vector<8x8xf32> to vector<8x8xbf16>
    %64 = vector.shape_cast %63 : vector<8x8xbf16> to vector<1x8x8xbf16>
    "tpu.trace_start"() <{level = 10 : i32, message = "bnd,bmd->bnm"}> : () -> ()
    %cst_23 = arith.constant dense<0.000000e+00> : vector<1x8x8xf32>
    %65 = tpu.matmul %58, %61, %cst_23 {dimension_numbers = #tpu.dot_dimension_numbers<[2], [2], [1], [1], [0, 0, 0, 1, 1, 1], [0], [0]>} : vector<1x8x8xbf16>, vector<1x8x8xbf16>, vector<1x8x8xf32> -> vector<1x8x8xf32>
    "tpu.trace_stop"() : () -> ()
    %cst_24 = arith.constant dense<0xFF800000> : vector<1x8xf32>
    %66 = vector.multi_reduction <maximumf>, %65, %cst_24 [2] : vector<1x8x8xf32> to vector<1x8xf32>
    %67 = vector.shape_cast %66 : vector<1x8xf32> to vector<1x8x1xf32>
    %68 = vector.broadcast %67 : vector<1x8x1xf32> to vector<1x8x8xf32>
    %69 = arith.subf %65, %68 : vector<1x8x8xf32>
    %70 = math.exp %69 : vector<1x8x8xf32>
    %cst_25 = arith.constant dense<0.000000e+00> : vector<1x8xf32>
    %71 = vector.multi_reduction <add>, %70, %cst_25 [2] : vector<1x8x8xf32> to vector<1x8xf32>
    %72 = vector.shape_cast %71 : vector<1x8xf32> to vector<1x8x1xf32>
    %73 = tpu.reciprocal %72 {approx = true} : vector<1x8x1xf32> -> vector<1x8x1xf32>
    %74 = vector.broadcast %73 : vector<1x8x1xf32> to vector<1x8x8xf32>
    %75 = arith.mulf %70, %74 : vector<1x8x8xf32>
    %76 = arith.truncf %75 : vector<1x8x8xf32> to vector<1x8x8xbf16>
    "tpu.trace_start"() <{level = 10 : i32, message = "bnm,bmd->bnd"}> : () -> ()
    %cst_26 = arith.constant dense<0.000000e+00> : vector<1x8x8xf32>
    %77 = tpu.matmul %76, %64, %cst_26 {dimension_numbers = #tpu.dot_dimension_numbers<[2], [1], [1], [2], [0, 0, 0, 1, 1, 2], [0], [0]>} : vector<1x8x8xbf16>, vector<1x8x8xbf16>, vector<1x8x8xf32> -> vector<1x8x8xf32>
    "tpu.trace_stop"() : () -> ()
    %78 = vector.shape_cast %77 : vector<1x8x8xf32> to vector<8x8xf32>
    %79 = arith.truncf %78 : vector<8x8xf32> to vector<8x8xbf16>
    %c0_27 = arith.constant 0 : index
    %c8 = arith.constant 8 : index
    %80 = vector.load %arg8[%c0_27, %c8] : memref<8x32xbf16, #tpu.memory_space<vmem>>, vector<8x8xbf16>
    tpu.vector_store %arg8[%c0_27, %c8], %79 {strides = array<i32>} : memref<8x32xbf16, #tpu.memory_space<vmem>>, vector<8x8xbf16>,
    %c2 = arith.constant 2 : index
    %c0_28 = arith.constant 0 : index
    %c0_29 = arith.constant 0 : index
    %81 = vector.load %arg4[%c2, %c0_28, %c0_29] : memref<4x32x24xbf16, #tpu.memory_space<vmem>>, vector<1x32x24xbf16>
    %82 = vector.shape_cast %81 : vector<1x32x24xbf16> to vector<32x24xbf16>
    %cst_30 = arith.constant dense<0.000000e+00> : vector<8x24xf32>
    %83 = tpu.matmul %24, %82, %cst_30 {dimension_numbers = #tpu.dot_dimension_numbers<[1], [0], [0], [1], [0, 0, 1, 1], [], []>} : vector<8x32xbf16>, vector<32x24xbf16>, vector<8x24xf32> -> vector<8x24xf32>
    %84 = vector.extract_strided_slice %83 {offsets = [0, 0], sizes = [8, 8], strides = [1, 1]} : vector<8x24xf32> to vector<8x8xf32>
    %85 = arith.truncf %84 : vector<8x8xf32> to vector<8x8xbf16>
    %86 = vector.shape_cast %85 : vector<8x8xbf16> to vector<1x8x8xbf16>
    %87 = vector.extract_strided_slice %83 {offsets = [0, 8], sizes = [8, 8], strides = [1, 1]} : vector<8x24xf32> to vector<8x8xf32>
    %88 = arith.truncf %87 : vector<8x8xf32> to vector<8x8xbf16>
    %89 = vector.shape_cast %88 : vector<8x8xbf16> to vector<1x8x8xbf16>
    %90 = vector.extract_strided_slice %83 {offsets = [0, 16], sizes = [8, 8], strides = [1, 1]} : vector<8x24xf32> to vector<8x8xf32>
    %91 = arith.truncf %90 : vector<8x8xf32> to vector<8x8xbf16>
    %92 = vector.shape_cast %91 : vector<8x8xbf16> to vector<1x8x8xbf16>
    "tpu.trace_start"() <{level = 10 : i32, message = "bnd,bmd->bnm"}> : () -> ()
    %cst_31 = arith.constant dense<0.000000e+00> : vector<1x8x8xf32>
    %93 = tpu.matmul %86, %89, %cst_31 {dimension_numbers = #tpu.dot_dimension_numbers<[2], [2], [1], [1], [0, 0, 0, 1, 1, 1], [0], [0]>} : vector<1x8x8xbf16>, vector<1x8x8xbf16>, vector<1x8x8xf32> -> vector<1x8x8xf32>
    "tpu.trace_stop"() : () -> ()
    %cst_32 = arith.constant dense<0xFF800000> : vector<1x8xf32>
    %94 = vector.multi_reduction <maximumf>, %93, %cst_32 [2] : vector<1x8x8xf32> to vector<1x8xf32>
    %95 = vector.shape_cast %94 : vector<1x8xf32> to vector<1x8x1xf32>
    %96 = vector.broadcast %95 : vector<1x8x1xf32> to vector<1x8x8xf32>
    %97 = arith.subf %93, %96 : vector<1x8x8xf32>
    %98 = math.exp %97 : vector<1x8x8xf32>
    %cst_33 = arith.constant dense<0.000000e+00> : vector<1x8xf32>
    %99 = vector.multi_reduction <add>, %98, %cst_33 [2] : vector<1x8x8xf32> to vector<1x8xf32>
    %100 = vector.shape_cast %99 : vector<1x8xf32> to vector<1x8x1xf32>
    %101 = tpu.reciprocal %100 {approx = true} : vector<1x8x1xf32> -> vector<1x8x1xf32>
    %102 = vector.broadcast %101 : vector<1x8x1xf32> to vector<1x8x8xf32>
    %103 = arith.mulf %98, %102 : vector<1x8x8xf32>
    %104 = arith.truncf %103 : vector<1x8x8xf32> to vector<1x8x8xbf16>
    "tpu.trace_start"() <{level = 10 : i32, message = "bnm,bmd->bnd"}> : () -> ()
    %cst_34 = arith.constant dense<0.000000e+00> : vector<1x8x8xf32>
    %105 = tpu.matmul %104, %92, %cst_34 {dimension_numbers = #tpu.dot_dimension_numbers<[2], [1], [1], [2], [0, 0, 0, 1, 1, 2], [0], [0]>} : vector<1x8x8xbf16>, vector<1x8x8xbf16>, vector<1x8x8xf32> -> vector<1x8x8xf32>
    "tpu.trace_stop"() : () -> ()
    %106 = vector.shape_cast %105 : vector<1x8x8xf32> to vector<8x8xf32>
    %107 = arith.truncf %106 : vector<8x8xf32> to vector<8x8xbf16>
    %c0_35 = arith.constant 0 : index
    %c16 = arith.constant 16 : index
    %108 = vector.load %arg8[%c0_35, %c16] : memref<8x32xbf16, #tpu.memory_space<vmem>>, vector<8x8xbf16>
    tpu.vector_store %arg8[%c0_35, %c16], %107 {strides = array<i32>} : memref<8x32xbf16, #tpu.memory_space<vmem>>, vector<8x8xbf16>,
    %c3 = arith.constant 3 : index
    %c0_36 = arith.constant 0 : index
    %c0_37 = arith.constant 0 : index
    %109 = vector.load %arg4[%c3, %c0_36, %c0_37] : memref<4x32x24xbf16, #tpu.memory_space<vmem>>, vector<1x32x24xbf16>
    %110 = vector.shape_cast %109 : vector<1x32x24xbf16> to vector<32x24xbf16>
    %cst_38 = arith.constant dense<0.000000e+00> : vector<8x24xf32>
    %111 = tpu.matmul %24, %110, %cst_38 {dimension_numbers = #tpu.dot_dimension_numbers<[1], [0], [0], [1], [0, 0, 1, 1], [], []>} : vector<8x32xbf16>, vector<32x24xbf16>, vector<8x24xf32> -> vector<8x24xf32>
    %112 = vector.extract_strided_slice %111 {offsets = [0, 0], sizes = [8, 8], strides = [1, 1]} : vector<8x24xf32> to vector<8x8xf32>
    %113 = arith.truncf %112 : vector<8x8xf32> to vector<8x8xbf16>
    %114 = vector.shape_cast %113 : vector<8x8xbf16> to vector<1x8x8xbf16>
    %115 = vector.extract_strided_slice %111 {offsets = [0, 8], sizes = [8, 8], strides = [1, 1]} : vector<8x24xf32> to vector<8x8xf32>
    %116 = arith.truncf %115 : vector<8x8xf32> to vector<8x8xbf16>
    %117 = vector.shape_cast %116 : vector<8x8xbf16> to vector<1x8x8xbf16>
    %118 = vector.extract_strided_slice %111 {offsets = [0, 16], sizes = [8, 8], strides = [1, 1]} : vector<8x24xf32> to vector<8x8xf32>
    %119 = arith.truncf %118 : vector<8x8xf32> to vector<8x8xbf16>
    %120 = vector.shape_cast %119 : vector<8x8xbf16> to vector<1x8x8xbf16>
    "tpu.trace_start"() <{level = 10 : i32, message = "bnd,bmd->bnm"}> : () -> ()
    %cst_39 = arith.constant dense<0.000000e+00> : vector<1x8x8xf32>
    %121 = tpu.matmul %114, %117, %cst_39 {dimension_numbers = #tpu.dot_dimension_numbers<[2], [2], [1], [1], [0, 0, 0, 1, 1, 1], [0], [0]>} : vector<1x8x8xbf16>, vector<1x8x8xbf16>, vector<1x8x8xf32> -> vector<1x8x8xf32>
    "tpu.trace_stop"() : () -> ()
    %cst_40 = arith.constant dense<0xFF800000> : vector<1x8xf32>
    %122 = vector.multi_reduction <maximumf>, %121, %cst_40 [2] : vector<1x8x8xf32> to vector<1x8xf32>
    %123 = vector.shape_cast %122 : vector<1x8xf32> to vector<1x8x1xf32>
    %124 = vector.broadcast %123 : vector<1x8x1xf32> to vector<1x8x8xf32>
    %125 = arith.subf %121, %124 : vector<1x8x8xf32>
    %126 = math.exp %125 : vector<1x8x8xf32>
    %cst_41 = arith.constant dense<0.000000e+00> : vector<1x8xf32>
    %127 = vector.multi_reduction <add>, %126, %cst_41 [2] : vector<1x8x8xf32> to vector<1x8xf32>
    %128 = vector.shape_cast %127 : vector<1x8xf32> to vector<1x8x1xf32>
    %129 = tpu.reciprocal %128 {approx = true} : vector<1x8x1xf32> -> vector<1x8x1xf32>
    %130 = vector.broadcast %129 : vector<1x8x1xf32> to vector<1x8x8xf32>
    %131 = arith.mulf %126, %130 : vector<1x8x8xf32>
    %132 = arith.truncf %131 : vector<1x8x8xf32> to vector<1x8x8xbf16>
    "tpu.trace_start"() <{level = 10 : i32, message = "bnm,bmd->bnd"}> : () -> ()
    %cst_42 = arith.constant dense<0.000000e+00> : vector<1x8x8xf32>
    %133 = tpu.matmul %132, %120, %cst_42 {dimension_numbers = #tpu.dot_dimension_numbers<[2], [1], [1], [2], [0, 0, 0, 1, 1, 2], [0], [0]>} : vector<1x8x8xbf16>, vector<1x8x8xbf16>, vector<1x8x8xf32> -> vector<1x8x8xf32>
    "tpu.trace_stop"() : () -> ()
    %134 = vector.shape_cast %133 : vector<1x8x8xf32> to vector<8x8xf32>
    %135 = arith.truncf %134 : vector<8x8xf32> to vector<8x8xbf16>
    %c0_43 = arith.constant 0 : index
    %c24 = arith.constant 24 : index
    %136 = vector.load %arg8[%c0_43, %c24] : memref<8x32xbf16, #tpu.memory_space<vmem>>, vector<8x8xbf16>
    tpu.vector_store %arg8[%c0_43, %c24], %135 {strides = array<i32>} : memref<8x32xbf16, #tpu.memory_space<vmem>>, vector<8x8xbf16>,
    %c0_44 = arith.constant 0 : index
    %c0_45 = arith.constant 0 : index
    %137 = vector.load %arg8[%c0_44, %c0_45] : memref<8x32xbf16, #tpu.memory_space<vmem>>, vector<8x32xbf16>
    %c0_46 = arith.constant 0 : index
    %c0_47 = arith.constant 0 : index
    %138 = vector.load %arg5[%c0_46, %c0_47] : memref<32x32xbf16, #tpu.memory_space<vmem>>, vector<32x32xbf16>
    %cst_48 = arith.constant dense<0.000000e+00> : vector<8x32xf32>
    %139 = tpu.matmul %137, %138, %cst_48 {dimension_numbers = #tpu.dot_dimension_numbers<[1], [0], [0], [1], [0, 0, 1, 1], [], []>} : vector<8x32xbf16>, vector<32x32xbf16>, vector<8x32xf32> -> vector<8x32xf32>
    %140 = arith.addf %1, %139 : vector<8x32xf32>
    %c0_49 = arith.constant 0 : index
    %c0_50 = arith.constant 0 : index
    %141 = vector.load %arg6[%c0_49, %c0_50] : memref<1x32xf32, #tpu.memory_space<vmem>>, vector<1x32xf32>
    %142 = vector.broadcast %141 : vector<1x32xf32> to vector<8x32xf32>
    %143 = arith.addf %140, %142 : vector<8x32xf32>
    %144 = vector.shape_cast %143 : vector<8x32xf32> to vector<1x8x32xf32>
    %c0_51 = arith.constant 0 : index
    %c0_52 = arith.constant 0 : index
    %c0_53 = arith.constant 0 : index
    %145 = vector.load %arg7[%c0_51, %c0_52, %c0_53] : memref<1x8x32xf32, #tpu.memory_space<vmem>>, vector<1x8x32xf32>
    tpu.vector_store %arg7[%c0_51, %c0_52, %c0_53], %144 {strides = array<i32>} : memref<1x8x32xf32, #tpu.memory_space<vmem>>, vector<1x8x32xf32>,
    return
  }
  func.func @transform_0(%arg0: i32) -> (i32, i32, i32) {
    %c0_i32 = arith.constant 0 : i32
    %c0_i32_0 = arith.constant 0 : i32
    %c0_i32_1 = arith.constant 0 : i32
    return %arg0, %c0_i32, %c0_i32_0 : i32, i32, i32
  }
  func.func @transform_1(%arg0: i32) -> (i32, i32) {
    %c0_i32 = arith.constant 0 : i32
    %c0_i32_0 = arith.constant 0 : i32
    %c0_i32_1 = arith.constant 0 : i32
    return %c0_i32, %c0_i32_0 : i32, i32
  }
  func.func @transform_2(%arg0: i32) -> (i32, i32) {
    %c0_i32 = arith.constant 0 : i32
    %c0_i32_0 = arith.constant 0 : i32
    %c0_i32_1 = arith.constant 0 : i32
    return %c0_i32, %c0_i32_0 : i32, i32
  }
  func.func @transform_3(%arg0: i32) -> (i32, i32, i32) {
    %c0_i32 = arith.constant 0 : i32
    %c0_i32_0 = arith.constant 0 : i32
    %c0_i32_1 = arith.constant 0 : i32
    %c0_i32_2 = arith.constant 0 : i32
    return %c0_i32, %c0_i32_0, %c0_i32_1 : i32, i32, i32
  }
  func.func @transform_4(%arg0: i32) -> (i32, i32) {
    %c0_i32 = arith.constant 0 : i32
    %c0_i32_0 = arith.constant 0 : i32
    %c0_i32_1 = arith.constant 0 : i32
    return %c0_i32, %c0_i32_0 : i32, i32
  }
  func.func @transform_5(%arg0: i32) -> (i32, i32) {
    %c0_i32 = arith.constant 0 : i32
    %c0_i32_0 = arith.constant 0 : i32
    %c0_i32_1 = arith.constant 0 : i32
    return %c0_i32, %c0_i32_0 : i32, i32
  }
  func.func @transform_6(%arg0: i32) -> (i32, i32, i32) {
    %c0_i32 = arith.constant 0 : i32
    %c0_i32_0 = arith.constant 0 : i32
    %c0_i32_1 = arith.constant 0 : i32
    return %arg0, %c0_i32, %c0_i32_0 : i32, i32, i32
  }
}

module attributes {stable_mosaic.version = 11 : i64} {
  func.func @global_block_kernel(%arg0: i32, %arg1: memref<1x8x32xf32, #tpu.memory_space<vmem>>, %arg2: memref<1x32xf32, #tpu.memory_space<vmem>>, %arg3: memref<1x32xf32, #tpu.memory_space<vmem>>, %arg4: memref<4x32x24xbf16, #tpu.memory_space<vmem>>, %arg5: memref<32x32xbf16, #tpu.memory_space<vmem>>, %arg6: memref<1x32xf32, #tpu.memory_space<vmem>>, %arg7: memref<1x8x32xf32, #tpu.memory_space<vmem>>, %arg8: memref<8x32xbf16, #tpu.memory_space<vmem>>) attributes {dimension_semantics = [#tpu.dimension_semantics<parallel>], iteration_bounds = array<i64: 2>, scalar_prefetch = 0 : i64, scratch_operands = 1 : i64, tpu.core_type = #tpu.core_type<tc>, window_params = [{transform_indices = @transform_0, window_bounds = array<i64: 1, 8, 32>}, {pipeline_mode = #tpu.pipeline_mode<synchronous>, transform_indices = @transform_1, window_bounds = array<i64: 1, 32>}, {pipeline_mode = #tpu.pipeline_mode<synchronous>, transform_indices = @transform_2, window_bounds = array<i64: 1, 32>}, {pipeline_mode = #tpu.pipeline_mode<synchronous>, transform_indices = @transform_3, window_bounds = array<i64: 4, 32, 24>}, {pipeline_mode = #tpu.pipeline_mode<synchronous>, transform_indices = @transform_4, window_bounds = array<i64: 32, 32>}, {pipeline_mode = #tpu.pipeline_mode<synchronous>, transform_indices = @transform_5, window_bounds = array<i64: 1, 32>}, {transform_indices = @transform_6, window_bounds = array<i64: 1, 8, 32>}]} {
    %c0 = arith.constant 0 : index
    %c0_0 = arith.constant 0 : index
    %c0_1 = arith.constant 0 : index
    %0 = vector.load %arg1[%c0, %c0_0, %c0_1] : memref<1x8x32xf32, #tpu.memory_space<vmem>>, vector<1x8x32xf32>
    %1 = vector.shape_cast %0 : vector<1x8x32xf32> to vector<8x32xf32>
    %cst = arith.constant dense<0.000000e+00> : vector<8xf32>
    %2 = vector.multi_reduction <add>, %1, %cst [1] : vector<8x32xf32> to vector<8xf32>
    %3 = vector.shape_cast %2 : vector<8xf32> to vector<8x1xf32>
    %cst_2 = arith.constant 3.200000e+01 : f32
    %4 = vector.broadcast %cst_2 : f32 to vector<8x1xf32>
    %5 = arith.divf %3, %4 : vector<8x1xf32>
    %6 = vector.broadcast %5 : vector<8x1xf32> to vector<8x32xf32>
    %7 = arith.subf %1, %6 : vector<8x32xf32>
    %8 = arith.mulf %7, %7 : vector<8x32xf32>
    %cst_3 = arith.constant dense<0.000000e+00> : vector<8xf32>
    %9 = vector.multi_reduction <add>, %8, %cst_3 [1] : vector<8x32xf32> to vector<8xf32>
    %10 = vector.shape_cast %9 : vector<8xf32> to vector<8x1xf32>
    %cst_4 = arith.constant 3.200000e+01 : f32
    %11 = vector.broadcast %cst_4 : f32 to vector<8x1xf32>
    %12 = arith.divf %10, %11 : vector<8x1xf32>
    %cst_5 = arith.constant 9.99999974E-6 : f32
    %13 = vector.broadcast %cst_5 : f32 to vector<8x1xf32>
    %14 = arith.addf %12, %13 : vector<8x1xf32>
    %15 = math.rsqrt %14 : vector<8x1xf32>
    %16 = vector.broadcast %15 : vector<8x1xf32> to vector<8x32xf32>
    %17 = arith.mulf %7, %16 : vector<8x32xf32>
    %c0_6 = arith.constant 0 : index
    %c0_7 = arith.constant 0 : index
    %18 = vector.load %arg2[%c0_6, %c0_7] : memref<1x32xf32, #tpu.memory_space<vmem>>, vector<1x32xf32>
    %19 = vector.broadcast %18 : vector<1x32xf32> to vector<8x32xf32>
    %20 = arith.mulf %17, %19 : vector<8x32xf32>
    %c0_8 = arith.constant 0 : index
    %c0_9 = arith.constant 0 : index
    %21 = vector.load %arg3[%c0_8, %c0_9] : memref<1x32xf32, #tpu.memory_space<vmem>>, vector<1x32xf32>
    %22 = vector.broadcast %21 : vector<1x32xf32> to vector<8x32xf32>
    %23 = arith.addf %20, %22 : vector<8x32xf32>
    %24 = arith.truncf %23 : vector<8x32xf32> to vector<8x32xbf16>
    %c0_10 = arith.constant 0 : index
    %c0_11 = arith.constant 0 : index
    %c0_12 = arith.constant 0 : index
    %25 = vector.load %arg4[%c0_10, %c0_11, %c0_12] : memref<4x32x24xbf16, #tpu.memory_space<vmem>>, vector<1x32x24xbf16>
    %26 = vector.shape_cast %25 : vector<1x32x24xbf16> to vector<32x24xbf16>
    %cst_13 = arith.constant dense<0.000000e+00> : vector<8x24xf32>
    %27 = tpu.matmul %24, %26, %cst_13 {dimension_numbers = #tpu.dot_dimension_numbers<[1], [0], [0], [1], [0, 0, 1, 1], [], []>} : vector<8x32xbf16>, vector<32x24xbf16>, vector<8x24xf32> -> vector<8x24xf32>
    %28 = vector.extract_strided_slice %27 {offsets = [0, 0], sizes = [8, 8], strides = [1, 1]} : vector<8x24xf32> to vector<8x8xf32>
    %29 = arith.truncf %28 : vector<8x8xf32> to vector<8x8xbf16>
    %30 = vector.shape_cast %29 : vector<8x8xbf16> to vector<1x8x8xbf16>
    %31 = vector.extract_strided_slice %27 {offsets = [0, 8], sizes = [8, 8], strides = [1, 1]} : vector<8x24xf32> to vector<8x8xf32>
    %32 = arith.truncf %31 : vector<8x8xf32> to vector<8x8xbf16>
    %33 = vector.shape_cast %32 : vector<8x8xbf16> to vector<1x8x8xbf16>
    %34 = vector.extract_strided_slice %27 {offsets = [0, 16], sizes = [8, 8], strides = [1, 1]} : vector<8x24xf32> to vector<8x8xf32>
    %35 = arith.truncf %34 : vector<8x8xf32> to vector<8x8xbf16>
    %36 = vector.shape_cast %35 : vector<8x8xbf16> to vector<1x8x8xbf16>
    "tpu.trace_start"() <{level = 10 : i32, message = "bnd,bmd->bnm"}> : () -> ()
    %cst_14 = arith.constant dense<0.000000e+00> : vector<1x8x8xf32>
    %37 = tpu.matmul %30, %33, %cst_14 {dimension_numbers = #tpu.dot_dimension_numbers<[2], [2], [1], [1], [0, 0, 0, 1, 1, 1], [0], [0]>} : vector<1x8x8xbf16>, vector<1x8x8xbf16>, vector<1x8x8xf32> -> vector<1x8x8xf32>
    "tpu.trace_stop"() : () -> ()
    %cst_15 = arith.constant dense<0xFF800000> : vector<1x8xf32>
    %38 = vector.multi_reduction <maximumf>, %37, %cst_15 [2] : vector<1x8x8xf32> to vector<1x8xf32>
    %39 = vector.shape_cast %38 : vector<1x8xf32> to vector<1x8x1xf32>
    %40 = vector.broadcast %39 : vector<1x8x1xf32> to vector<1x8x8xf32>
    %41 = arith.subf %37, %40 : vector<1x8x8xf32>
    %42 = math.exp %41 : vector<1x8x8xf32>
    %cst_16 = arith.constant dense<0.000000e+00> : vector<1x8xf32>
    %43 = vector.multi_reduction <add>, %42, %cst_16 [2] : vector<1x8x8xf32> to vector<1x8xf32>
    %44 = vector.shape_cast %43 : vector<1x8xf32> to vector<1x8x1xf32>
    %45 = tpu.reciprocal %44 {approx = true} : vector<1x8x1xf32> -> vector<1x8x1xf32>
    %46 = vector.broadcast %45 : vector<1x8x1xf32> to vector<1x8x8xf32>
    %47 = arith.mulf %42, %46 : vector<1x8x8xf32>
    %48 = arith.truncf %47 : vector<1x8x8xf32> to vector<1x8x8xbf16>
    "tpu.trace_start"() <{level = 10 : i32, message = "bnm,bmd->bnd"}> : () -> ()
    %cst_17 = arith.constant dense<0.000000e+00> : vector<1x8x8xf32>
    %49 = tpu.matmul %48, %36, %cst_17 {dimension_numbers = #tpu.dot_dimension_numbers<[2], [1], [1], [2], [0, 0, 0, 1, 1, 2], [0], [0]>} : vector<1x8x8xbf16>, vector<1x8x8xbf16>, vector<1x8x8xf32> -> vector<1x8x8xf32>
    "tpu.trace_stop"() : () -> ()
    %50 = vector.shape_cast %49 : vector<1x8x8xf32> to vector<8x8xf32>
    %51 = arith.truncf %50 : vector<8x8xf32> to vector<8x8xbf16>
    %c0_18 = arith.constant 0 : index
    %c0_19 = arith.constant 0 : index
    %52 = vector.load %arg8[%c0_18, %c0_19] : memref<8x32xbf16, #tpu.memory_space<vmem>>, vector<8x8xbf16>
    tpu.vector_store %arg8[%c0_18, %c0_19], %51 {strides = array<i32>} : memref<8x32xbf16, #tpu.memory_space<vmem>>, vector<8x8xbf16>,
    %c1 = arith.constant 1 : index
    %c0_20 = arith.constant 0 : index
    %c0_21 = arith.constant 0 : index
    %53 = vector.load %arg4[%c1, %c0_20, %c0_21] : memref<4x32x24xbf16, #tpu.memory_space<vmem>>, vector<1x32x24xbf16>
    %54 = vector.shape_cast %53 : vector<1x32x24xbf16> to vector<32x24xbf16>
    %cst_22 = arith.constant dense<0.000000e+00> : vector<8x24xf32>
    %55 = tpu.matmul %24, %54, %cst_22 {dimension_numbers = #tpu.dot_dimension_numbers<[1], [0], [0], [1], [0, 0, 1, 1], [], []>} : vector<8x32xbf16>, vector<32x24xbf16>, vector<8x24xf32> -> vector<8x24xf32>
    %56 = vector.extract_strided_slice %55 {offsets = [0, 0], sizes = [8, 8], strides = [1, 1]} : vector<8x24xf32> to vector<8x8xf32>
    %57 = arith.truncf %56 : vector<8x8xf32> to vector<8x8xbf16>
    %58 = vector.shape_cast %57 : vector<8x8xbf16> to vector<1x8x8xbf16>
    %59 = vector.extract_strided_slice %55 {offsets = [0, 8], sizes = [8, 8], strides = [1, 1]} : vector<8x24xf32> to vector<8x8xf32>
    %60 = arith.truncf %59 : vector<8x8xf32> to vector<8x8xbf16>
    %61 = vector.shape_cast %60 : vector<8x8xbf16> to vector<1x8x8xbf16>
    %62 = vector.extract_strided_slice %55 {offsets = [0, 16], sizes = [8, 8], strides = [1, 1]} : vector<8x24xf32> to vector<8x8xf32>
    %63 = arith.truncf %62 : vector<8x8xf32> to vector<8x8xbf16>
    %64 = vector.shape_cast %63 : vector<8x8xbf16> to vector<1x8x8xbf16>
    "tpu.trace_start"() <{level = 10 : i32, message = "bnd,bmd->bnm"}> : () -> ()
    %cst_23 = arith.constant dense<0.000000e+00> : vector<1x8x8xf32>
    %65 = tpu.matmul %58, %61, %cst_23 {dimension_numbers = #tpu.dot_dimension_numbers<[2], [2], [1], [1], [0, 0, 0, 1, 1, 1], [0], [0]>} : vector<1x8x8xbf16>, vector<1x8x8xbf16>, vector<1x8x8xf32> -> vector<1x8x8xf32>
    "tpu.trace_stop"() : () -> ()
    %cst_24 = arith.constant dense<0xFF800000> : vector<1x8xf32>
    %66 = vector.multi_reduction <maximumf>, %65, %cst_24 [2] : vector<1x8x8xf32> to vector<1x8xf32>
    %67 = vector.shape_cast %66 : vector<1x8xf32> to vector<1x8x1xf32>
    %68 = vector.broadcast %67 : vector<1x8x1xf32> to vector<1x8x8xf32>
    %69 = arith.subf %65, %68 : vector<1x8x8xf32>
    %70 = math.exp %69 : vector<1x8x8xf32>
    %cst_25 = arith.constant dense<0.000000e+00> : vector<1x8xf32>
    %71 = vector.multi_reduction <add>, %70, %cst_25 [2] : vector<1x8x8xf32> to vector<1x8xf32>
    %72 = vector.shape_cast %71 : vector<1x8xf32> to vector<1x8x1xf32>
    %73 = tpu.reciprocal %72 {approx = true} : vector<1x8x1xf32> -> vector<1x8x1xf32>
    %74 = vector.broadcast %73 : vector<1x8x1xf32> to vector<1x8x8xf32>
    %75 = arith.mulf %70, %74 : vector<1x8x8xf32>
    %76 = arith.truncf %75 : vector<1x8x8xf32> to vector<1x8x8xbf16>
    "tpu.trace_start"() <{level = 10 : i32, message = "bnm,bmd->bnd"}> : () -> ()
    %cst_26 = arith.constant dense<0.000000e+00> : vector<1x8x8xf32>
    %77 = tpu.matmul %76, %64, %cst_26 {dimension_numbers = #tpu.dot_dimension_numbers<[2], [1], [1], [2], [0, 0, 0, 1, 1, 2], [0], [0]>} : vector<1x8x8xbf16>, vector<1x8x8xbf16>, vector<1x8x8xf32> -> vector<1x8x8xf32>
    "tpu.trace_stop"() : () -> ()
    %78 = vector.shape_cast %77 : vector<1x8x8xf32> to vector<8x8xf32>
    %79 = arith.truncf %78 : vector<8x8xf32> to vector<8x8xbf16>
    %c0_27 = arith.constant 0 : index
    %c8 = arith.constant 8 : index
    %80 = vector.load %arg8[%c0_27, %c8] : memref<8x32xbf16, #tpu.memory_space<vmem>>, vector<8x8xbf16>
    tpu.vector_store %arg8[%c0_27, %c8], %79 {strides = array<i32>} : memref<8x32xbf16, #tpu.memory_space<vmem>>, vector<8x8xbf16>,
    %c2 = arith.constant 2 : index
    %c0_28 = arith.constant 0 : index
    %c0_29 = arith.constant 0 : index
    %81 = vector.load %arg4[%c2, %c0_28, %c0_29] : memref<4x32x24xbf16, #tpu.memory_space<vmem>>, vector<1x32x24xbf16>
    %82 = vector.shape_cast %81 : vector<1x32x24xbf16> to vector<32x24xbf16>
    %cst_30 = arith.constant dense<0.000000e+00> : vector<8x24xf32>
    %83 = tpu.matmul %24, %82, %cst_30 {dimension_numbers = #tpu.dot_dimension_numbers<[1], [0], [0], [1], [0, 0, 1, 1], [], []>} : vector<8x32xbf16>, vector<32x24xbf16>, vector<8x24xf32> -> vector<8x24xf32>
    %84 = vector.extract_strided_slice %83 {offsets = [0, 0], sizes = [8, 8], strides = [1, 1]} : vector<8x24xf32> to vector<8x8xf32>
    %85 = arith.truncf %84 : vector<8x8xf32> to vector<8x8xbf16>
    %86 = vector.shape_cast %85 : vector<8x8xbf16> to vector<1x8x8xbf16>
    %87 = vector.extract_strided_slice %83 {offsets = [0, 8], sizes = [8, 8], strides = [1, 1]} : vector<8x24xf32> to vector<8x8xf32>
    %88 = arith.truncf %87 : vector<8x8xf32> to vector<8x8xbf16>
    %89 = vector.shape_cast %88 : vector<8x8xbf16> to vector<1x8x8xbf16>
    %90 = vector.extract_strided_slice %83 {offsets = [0, 16], sizes = [8, 8], strides = [1, 1]} : vector<8x24xf32> to vector<8x8xf32>
    %91 = arith.truncf %90 : vector<8x8xf32> to vector<8x8xbf16>
    %92 = vector.shape_cast %91 : vector<8x8xbf16> to vector<1x8x8xbf16>
    "tpu.trace_start"() <{level = 10 : i32, message = "bnd,bmd->bnm"}> : () -> ()
    %cst_31 = arith.constant dense<0.000000e+00> : vector<1x8x8xf32>
    %93 = tpu.matmul %86, %89, %cst_31 {dimension_numbers = #tpu.dot_dimension_numbers<[2], [2], [1], [1], [0, 0, 0, 1, 1, 1], [0], [0]>} : vector<1x8x8xbf16>, vector<1x8x8xbf16>, vector<1x8x8xf32> -> vector<1x8x8xf32>
    "tpu.trace_stop"() : () -> ()
    %cst_32 = arith.constant dense<0xFF800000> : vector<1x8xf32>
    %94 = vector.multi_reduction <maximumf>, %93, %cst_32 [2] : vector<1x8x8xf32> to vector<1x8xf32>
    %95 = vector.shape_cast %94 : vector<1x8xf32> to vector<1x8x1xf32>
    %96 = vector.broadcast %95 : vector<1x8x1xf32> to vector<1x8x8xf32>
    %97 = arith.subf %93, %96 : vector<1x8x8xf32>
    %98 = math.exp %97 : vector<1x8x8xf32>
    %cst_33 = arith.constant dense<0.000000e+00> : vector<1x8xf32>
    %99 = vector.multi_reduction <add>, %98, %cst_33 [2] : vector<1x8x8xf32> to vector<1x8xf32>
    %100 = vector.shape_cast %99 : vector<1x8xf32> to vector<1x8x1xf32>
    %101 = tpu.reciprocal %100 {approx = true} : vector<1x8x1xf32> -> vector<1x8x1xf32>
    %102 = vector.broadcast %101 : vector<1x8x1xf32> to vector<1x8x8xf32>
    %103 = arith.mulf %98, %102 : vector<1x8x8xf32>
    %104 = arith.truncf %103 : vector<1x8x8xf32> to vector<1x8x8xbf16>
    "tpu.trace_start"() <{level = 10 : i32, message = "bnm,bmd->bnd"}> : () -> ()
    %cst_34 = arith.constant dense<0.000000e+00> : vector<1x8x8xf32>
    %105 = tpu.matmul %104, %92, %cst_34 {dimension_numbers = #tpu.dot_dimension_numbers<[2], [1], [1], [2], [0, 0, 0, 1, 1, 2], [0], [0]>} : vector<1x8x8xbf16>, vector<1x8x8xbf16>, vector<1x8x8xf32> -> vector<1x8x8xf32>
    "tpu.trace_stop"() : () -> ()
    %106 = vector.shape_cast %105 : vector<1x8x8xf32> to vector<8x8xf32>
    %107 = arith.truncf %106 : vector<8x8xf32> to vector<8x8xbf16>
    %c0_35 = arith.constant 0 : index
    %c16 = arith.constant 16 : index
    %108 = vector.load %arg8[%c0_35, %c16] : memref<8x32xbf16, #tpu.memory_space<vmem>>, vector<8x8xbf16>
    tpu.vector_store %arg8[%c0_35, %c16], %107 {strides = array<i32>} : memref<8x32xbf16, #tpu.memory_space<vmem>>, vector<8x8xbf16>,
    %c3 = arith.constant 3 : index
    %c0_36 = arith.constant 0 : index
    %c0_37 = arith.constant 0 : index
    %109 = vector.load %arg4[%c3, %c0_36, %c0_37] : memref<4x32x24xbf16, #tpu.memory_space<vmem>>, vector<1x32x24xbf16>
    %110 = vector.shape_cast %109 : vector<1x32x24xbf16> to vector<32x24xbf16>
    %cst_38 = arith.constant dense<0.000000e+00> : vector<8x24xf32>
    %111 = tpu.matmul %24, %110, %cst_38 {dimension_numbers = #tpu.dot_dimension_numbers<[1], [0], [0], [1], [0, 0, 1, 1], [], []>} : vector<8x32xbf16>, vector<32x24xbf16>, vector<8x24xf32> -> vector<8x24xf32>
    %112 = vector.extract_strided_slice %111 {offsets = [0, 0], sizes = [8, 8], strides = [1, 1]} : vector<8x24xf32> to vector<8x8xf32>
    %113 = arith.truncf %112 : vector<8x8xf32> to vector<8x8xbf16>
    %114 = vector.shape_cast %113 : vector<8x8xbf16> to vector<1x8x8xbf16>
    %115 = vector.extract_strided_slice %111 {offsets = [0, 8], sizes = [8, 8], strides = [1, 1]} : vector<8x24xf32> to vector<8x8xf32>
    %116 = arith.truncf %115 : vector<8x8xf32> to vector<8x8xbf16>
    %117 = vector.shape_cast %116 : vector<8x8xbf16> to vector<1x8x8xbf16>
    %118 = vector.extract_strided_slice %111 {offsets = [0, 16], sizes = [8, 8], strides = [1, 1]} : vector<8x24xf32> to vector<8x8xf32>
    %119 = arith.truncf %118 : vector<8x8xf32> to vector<8x8xbf16>
    %120 = vector.shape_cast %119 : vector<8x8xbf16> to vector<1x8x8xbf16>
    "tpu.trace_start"() <{level = 10 : i32, message = "bnd,bmd->bnm"}> : () -> ()
    %cst_39 = arith.constant dense<0.000000e+00> : vector<1x8x8xf32>
    %121 = tpu.matmul %114, %117, %cst_39 {dimension_numbers = #tpu.dot_dimension_numbers<[2], [2], [1], [1], [0, 0, 0, 1, 1, 1], [0], [0]>} : vector<1x8x8xbf16>, vector<1x8x8xbf16>, vector<1x8x8xf32> -> vector<1x8x8xf32>
    "tpu.trace_stop"() : () -> ()
    %cst_40 = arith.constant dense<0xFF800000> : vector<1x8xf32>
    %122 = vector.multi_reduction <maximumf>, %121, %cst_40 [2] : vector<1x8x8xf32> to vector<1x8xf32>
    %123 = vector.shape_cast %122 : vector<1x8xf32> to vector<1x8x1xf32>
    %124 = vector.broadcast %123 : vector<1x8x1xf32> to vector<1x8x8xf32>
    %125 = arith.subf %121, %124 : vector<1x8x8xf32>
    %126 = math.exp %125 : vector<1x8x8xf32>
    %cst_41 = arith.constant dense<0.000000e+00> : vector<1x8xf32>
    %127 = vector.multi_reduction <add>, %126, %cst_41 [2] : vector<1x8x8xf32> to vector<1x8xf32>
    %128 = vector.shape_cast %127 : vector<1x8xf32> to vector<1x8x1xf32>
    %129 = tpu.reciprocal %128 {approx = true} : vector<1x8x1xf32> -> vector<1x8x1xf32>
    %130 = vector.broadcast %129 : vector<1x8x1xf32> to vector<1x8x8xf32>
    %131 = arith.mulf %126, %130 : vector<1x8x8xf32>
    %132 = arith.truncf %131 : vector<1x8x8xf32> to vector<1x8x8xbf16>
    "tpu.trace_start"() <{level = 10 : i32, message = "bnm,bmd->bnd"}> : () -> ()
    %cst_42 = arith.constant dense<0.000000e+00> : vector<1x8x8xf32>
    %133 = tpu.matmul %132, %120, %cst_42 {dimension_numbers = #tpu.dot_dimension_numbers<[2], [1], [1], [2], [0, 0, 0, 1, 1, 2], [0], [0]>} : vector<1x8x8xbf16>, vector<1x8x8xbf16>, vector<1x8x8xf32> -> vector<1x8x8xf32>
    "tpu.trace_stop"() : () -> ()
    %134 = vector.shape_cast %133 : vector<1x8x8xf32> to vector<8x8xf32>
    %135 = arith.truncf %134 : vector<8x8xf32> to vector<8x8xbf16>
    %c0_43 = arith.constant 0 : index
    %c24 = arith.constant 24 : index
    %136 = vector.load %arg8[%c0_43, %c24] : memref<8x32xbf16, #tpu.memory_space<vmem>>, vector<8x8xbf16>
    tpu.vector_store %arg8[%c0_43, %c24], %135 {strides = array<i32>} : memref<8x32xbf16, #tpu.memory_space<vmem>>, vector<8x8xbf16>,
    %c0_44 = arith.constant 0 : index
    %c0_45 = arith.constant 0 : index
    %137 = vector.load %arg8[%c0_44, %c0_45] : memref<8x32xbf16, #tpu.memory_space<vmem>>, vector<8x32xbf16>
    %c0_46 = arith.constant 0 : index
    %c0_47 = arith.constant 0 : index
    %138 = vector.load %arg5[%c0_46, %c0_47] : memref<32x32xbf16, #tpu.memory_space<vmem>>, vector<32x32xbf16>
    %cst_48 = arith.constant dense<0.000000e+00> : vector<8x32xf32>
    %139 = tpu.matmul %137, %138, %cst_48 {dimension_numbers = #tpu.dot_dimension_numbers<[1], [0], [0], [1], [0, 0, 1, 1], [], []>} : vector<8x32xbf16>, vector<32x32xbf16>, vector<8x32xf32> -> vector<8x32xf32>
    %140 = arith.addf %1, %139 : vector<8x32xf32>
    %c0_49 = arith.constant 0 : index
    %c0_50 = arith.constant 0 : index
    %141 = vector.load %arg6[%c0_49, %c0_50] : memref<1x32xf32, #tpu.memory_space<vmem>>, vector<1x32xf32>
    %142 = vector.broadcast %141 : vector<1x32xf32> to vector<8x32xf32>
    %143 = arith.addf %140, %142 : vector<8x32xf32>
    %144 = vector.shape_cast %143 : vector<8x32xf32> to vector<1x8x32xf32>
    %c0_51 = arith.constant 0 : index
    %c0_52 = arith.constant 0 : index
    %c0_53 = arith.constant 0 : index
    %145 = vector.load %arg7[%c0_51, %c0_52, %c0_53] : memref<1x8x32xf32, #tpu.memory_space<vmem>>, vector<1x8x32xf32>
    tpu.vector_store %arg7[%c0_51, %c0_52, %c0_53], %144 {strides = array<i32>} : memref<1x8x32xf32, #tpu.memory_space<vmem>>, vector<1x8x32xf32>,
    return
  }
  func.func @transform_0(%arg0: i32) -> (i32, i32, i32) {
    %c0_i32 = arith.constant 0 : i32
    %c0_i32_0 = arith.constant 0 : i32
    %c0_i32_1 = arith.constant 0 : i32
    return %arg0, %c0_i32, %c0_i32_0 : i32, i32, i32
  }
  func.func @transform_1(%arg0: i32) -> (i32, i32) {
    %c0_i32 = arith.constant 0 : i32
    %c0_i32_0 = arith.constant 0 : i32
    %c0_i32_1 = arith.constant 0 : i32
    return %c0_i32, %c0_i32_0 : i32, i32
  }
  func.func @transform_2(%arg0: i32) -> (i32, i32) {
    %c0_i32 = arith.constant 0 : i32
    %c0_i32_0 = arith.constant 0 : i32
    %c0_i32_1 = arith.constant 0 : i32
    return %c0_i32, %c0_i32_0 : i32, i32
  }
  func.func @transform_3(%arg0: i32) -> (i32, i32, i32) {
    %c0_i32 = arith.constant 0 : i32
    %c0_i32_0 = arith.constant 0 : i32
    %c0_i32_1 = arith.constant 0 : i32
    %c0_i32_2 = arith.constant 0 : i32
    return %c0_i32, %c0_i32_0, %c0_i32_1 : i32, i32, i32
  }
  func.func @transform_4(%arg0: i32) -> (i32, i32) {
    %c0_i32 = arith.constant 0 : i32
    %c0_i32_0 = arith.constant 0 : i32
    %c0_i32_1 = arith.constant 0 : i32
    return %c0_i32, %c0_i32_0 : i32, i32
  }
  func.func @transform_5(%arg0: i32) -> (i32, i32) {
    %c0_i32 = arith.constant 0 : i32
    %c0_i32_0 = arith.constant 0 : i32
    %c0_i32_1 = arith.constant 0 : i32
    return %c0_i32, %c0_i32_0 : i32, i32
  }
  func.func @transform_6(%arg0: i32) -> (i32, i32, i32) {
    %c0_i32 = arith.constant 0 : i32
    %c0_i32_0 = arith.constant 0 : i32
    %c0_i32_1 = arith.constant 0 : i32
    return %arg0, %c0_i32, %c0_i32_0 : i32, i32, i32
  }
}

</mosaic_0001>

<bundles_post_ra>
// kernel: tpu_custom_call.1
= control target key start
LH: loop header
LB: loop body
LE: loop exit
PB: predicated region body
PF: predicated region fallthrough
CT: control target
= control target key end

     0   :  { %11 = vsyncpa [#allocation4], 0  ;;  %s1711_s0 = inlined_call_operand.vmem [shape: f32[2,8,32], index: 0, kind: input, shape index: {}]   ;;  %s1712_s1 = inlined_call_operand.vmem [shape: f32[1,32], index: 1, kind: input, shape index: {}]   ;;  %s1713_s2 = inlined_call_operand.vmem [shape: f32[1,32], index: 2, kind: input, shape index: {}]   ;;  %s1714_s3 = inlined_call_operand.vmem [shape: bf16[4,32,24], index: 3, kind: input, shape index: {}]   ;;  %s1715_s4 = inlined_call_operand.vmem [shape: bf16[32,32], index: 4, kind: input, shape index: {}]   ;;  %s1716_s5 = inlined_call_operand.vmem [shape: f32[1,32], index: 5, kind: input, shape index: {}]   ;;  %s1717_s6 = inlined_call_operand.hbm [shape: f32[2,8,32], index: 6, kind: output, shape index: {}]  }
   0x1   :  { %13 = vsyncpa [#allocation4 + $0x1], 0  ;;  %s1478_s21 = smov 0   ;;  %s1480_s22 = smov 0  }
   0x2   :  { %s1482_s23 = smov 0   ;;  %s1484_s24 = smov 0  }
   0x3 LB: > { %s1499_s25 = sadd.s32 4294967295, %s1433_s24   ;;  %s1126_s26 = sadd.s32 4294967294, %s1433_s24   ;;  %s1433_s24 = sphi %s1484_s24, %s1723_s24   ;;  %s1429_s23 = sphi %s1482_s23, %s1722_s23   ;;  %s1425_s22 = sphi %s1480_s22, %s1721_s22   ;;  %s1421_s21 = sphi %s1478_s21, %s1720_s21  }
   0x4   : > { %s1503_s27 = sadd.s32 1, %s1433_s24   ;;  %s157_s28 = sadd.s32 1, %s1429_s23 }
   0x5   : > { %s154_s29 = ssub.s32 %s1433_s24, %s1503_s27  ;;  %p167_p0 = scmp.ne.s32.totalorder %s1429_s23, %s1425_s22 }
   0x6   : > { %p155_p1 = scmp.eq.s32.totalorder %s154_s29, 0  ;;  %p168_p2 = scmp.eq.s32.totalorder %s1499_s25, 1 }
   0x7   : > { %p173_p3 = scmp.ne.s32.totalorder %s1425_s22, %s1421_s21  ;;  %p174_p4 = scmp.eq.s32.totalorder %s1126_s26, 1 }
   0x8   : > { %s1514_s30 = scalar_select %p155_p1, %s1429_s23, %s157_s28  }
   0x9   : > { %p1516_p5 = por %p168_p2, %p167_p0  ;;  %p1520_p6 = por %p174_p4, %p173_p3 }
   0xa   : > { %p1129_p7 = scmp.ge.s32.totalorder %s1433_s24, 1  ;;  %p214_p8 = scmp.lt.s32.totalorder %s1433_s24, 3 }
   0xc   : > { %p215_p9 = pnand %p1129_p7, %p214_p8 }
   0xd   : > { %p243_p10 = scmp.lt.s32.totalorder (!%p215_p9), %s1499_s25, 1  ;;  %s1437_s28 = smov (!%p215_p9), 112  }
   0xe   : > { %218 = sbr.rel (%p215_p9) target bundleno = 3233 (0xca1), region = 44  ;;  %s1438_s29 = smov (!%p215_p9), 120  }
   0xf   : > { %s1439_s26 = smov (!%p215_p9), 8   ;;  %s1441_s12 = smov (!%p215_p9), 24  }
  0x10   : > { %s1174_s17 = sshll.u32 (!%p215_p9), %s1499_s25, 7 }
  0x13   : > { %s244_s9 = scalar_select %p243_p10, %s1499_s25, 1  ;;  %vm249_vm0 = vcmask 261120   ;;  %v1345_v7 = vld [vmem:[%s1714_s3 + $0x8] sm:$0xff]   ;;  %v1435_v8 = vmov 0.0   ;;  %vm1436_vm1 = vmmov 0   ;;  %v1346_v9 = vld [vmem:[%s1714_s3] sm:$0xff]  }
  0x14   : > { %1211 = vmatprep.subr.bf16.mxu0 %v1435_v8  ;;  %1215 = vmatprep.mubr.msk.bf16.mxu0 %vm1436_vm1, %v1435_v8  ;;  %v1132_v14 = vld [vmem:[%s1712_s1] ss:$0 sm:$0xff]  ;;  %vm408_vm2 = vcmask 1043456   ;;  %vm344_vm3 = vcmask 64512   ;;  %v1347_v29 = vld [vmem:[%s1714_s3 + $0x18] sm:$0xff]   ;;  %v1348_v30 = vld [vmem:[%s1714_s3 + $0x10] sm:$0xff]  }
  0x15   : > { %s1131_s10 = sshll.u32 %s244_s9, 3  ;;  %1212 = vmatpush3.bf16.msra.mxu0 %v1345_v7  ;;  %1219 = vmatprep.subr.bf16.mxu1 %v1435_v8  ;;  %v1133_v16 = vld [vmem:[%s1713_s2] ss:$0 sm:$0xff]  ;;  %v1349_v54 = vld [vmem:[%s1714_s3 + $0x28] sm:$0xff]   ;;  %vm453_vm4 = vcmask 60416   ;;  %vm629_vm5 = vcmask 126016  }
  0x16   : > { %s246_s13 = scalar_lea.vmem %s1711_s0, %s1131_s10  ;;  %1213 = vmatprep.subr.bf16.mxu0 %v1435_v8  ;;  %1221 = vmatprep.mubr.msk.bf16.mxu1 %vm1436_vm1, %v1435_v8  ;;  %v1350_v55 = vld [vmem:[%s1714_s3 + $0x20] sm:$0xff]   ;;  %vm805_vm6 = vcmask 191616   ;;  %vm981_vm7 = vcmask 257216   ;;  %s1442_s9 = smov [#allocation3]  }
  0x17   : > { %v1531_v0 = vld [vmem:[%s246_s13] sm:$0xff]  ;;  %s240_s13 = sand.u32 1, %s1425_s22   ;;  %s1377_s10 = sshll.u32 %s1442_s9, 4  ;;  %s1378_s10 = int_to_ptr.vmem [resolvable:$false] %s1377_s10 }
  0x18   : > { %v250_v1 = vsel %vm249_vm0, %v1531_v0, 0.0  ;;  %s1130_s14 = sshll.u32 %s240_s13, 3  ;;  %s1054_s25 = scalar_lea.sflag [#allocation4], %s240_s13 }
  0x19   : > { %251 = vadd.xlane.f32.xlu0 %v250_v1  ;;  %1214 = vmatpush3.bf16.msra.mxu0 %v1346_v9  ;;  %s242_s18 = scalar_lea.vmem [#allocation3], %s1130_s14  ;;  %s1379_s11 = scalar_lea.vmem %s1378_s10, 256 }
  0x1a   : > { %1225 = vmatprep.subr.bf16.mxu0 %v1435_v8  ;;  %s1067_s19 = sshll.u32 %s242_s18, 4  ;;  %s1671_s19 = int_to_ptr.vmem [resolvable:$true] %s1067_s19 }
  0x1b   : > { %p1380_p0 = scmp.lt.s32.totalorder %s1671_s19, %s1378_s10 }
  0xa2   : > { %v252_v2 = vpop.xlane.xlu0 %251 }
  0xa3   : > { %v254_v3 = vmul.f32 0.03125, %v252_v2 }
  0xa5   : > { %v255_v4 = vsub.f32 %v1531_v0, %v254_v3 }
  0xa7   : > { %v256_v5 = vmul.f32 %v255_v4, %v255_v4 }
  0xa9   : > { %v257_v6 = vsel %vm249_vm0, %v256_v5, 0.0 }
  0xaa   : > { %258 = vadd.xlane.f32.xlu0 %v257_v6 }
 0x133   : > { %v259_v10 = vpop.xlane.xlu0 %258 }
 0x134   : > { %v260_v11 = vmul.f32 0.03125, %v259_v10 }
 0x136   : > { %v261_v12 = vadd.f32 1e-05, %v260_v11 }
 0x138   : > { %1355 = vrsqrt.f32 %v261_v12 }
 0x145   : > { %v1356_v13 = vpop.eup %1355 }
 0x146   : > { %v263_v15 = vmul.f32 %v1356_v13, %v255_v4 }
 0x148   : > { %v271_v17 = vmul.f32 %v1132_v14, %v263_v15 }
 0x14a   : > { %v279_v18 = vadd.f32 %v1133_v16, %v271_v17 }
 0x14c   : > { %v1557_v19 = vpack.c.bf16 %v279_v18, %v279_v18 }
 0x14e   : > { %1216 = vmatmul.mubr.msk.bf16.vlgmr.msra.gmra.mxu0 %vm249_vm0, %v1557_v19 }
 0x14f   : > { %1227 = vmatprep.mubr.msk.bf16.mxu0 %vm1436_vm1, %v1435_v8 }
 0x20e   : > { %v334_v20 = vpop.f32.mrf.mxu0 }
 0x20f   : > { %v340_v21 = vpack.c.bf16 %v334_v20, %v334_v20 }
 0x210   : > { %v1217_v22 = vpop.f32.mrf.mxu0 }
 0x211   : > { %403 = vrot.lane.b32.xlu0 %v340_v21, %s1437_s28  ;;  %342 = vrot.lane.b32.xlu1 %v340_v21, %s1438_s29 }
 0x212   : > { %v337_v23 = vpop.f32.mrf.mxu0 }
 0x213   : > { %v1351_v23 = vld [vmem:[%s1714_s3 + $0x38] sm:$0xff]  }
 0x214   : > { %v1218_v24 = vpop.f32.mrf.mxu0 }
 0x215   : > { %v1352_v24 = vld [vmem:[%s1714_s3 + $0x30] sm:$0xff]  }
 0x283   : > { %v404_v25 = vpop.permute.xlu0 %403  ;;  %v343_v26 = vpop.permute.xlu1 %342 }
 0x284   : > { %v410_v27 = vsel %vm408_vm2, %v404_v25, 0  ;;  %v349_v28 = vsel %vm344_vm3, %v343_v26, 0 }
 0x285   : > { %1220 = vmatpush3.bf16.xpose.msra.mxu1 %v349_v28  ;;  %1226 = vmatpush3.bf16.msra.mxu0 %v410_v27 }
 0x286   : > { %1231 = vmatprep.subr.bf16.mxu1 %v1435_v8  ;;  %1239 = vmatprep.subr.bf16.mxu0 %v1435_v8 }
 0x28c   : > { %1222 = vmatmul.mubr.msk.bf16.vlgmr.msra.gmra.mxu1 %vm344_vm3, %v340_v21 }
 0x28d   : > { %1232 = vmatpush3.bf16.msra.mxu1 %v1347_v29  ;;  %1235 = vmatprep.mubr.msk.bf16.mxu1 %vm1436_vm1, %v1435_v8 }
 0x28e   : > { %1233 = vmatprep.subr.bf16.mxu1 %v1435_v8 }
 0x291   : > { %1234 = vmatpush3.bf16.msra.mxu1 %v1348_v30 }
 0x292   : > { %1245 = vmatprep.subr.bf16.mxu1 %v1435_v8 }
 0x294   : > { %1236 = vmatmul.mubr.msk.bf16.vlgmr.msra.gmra.mxu1 %vm249_vm0, %v1557_v19 }
 0x295   : > { %1247 = vmatprep.mubr.msk.bf16.mxu1 %vm1436_vm1, %v1435_v8 }
 0x34c   : > { %v385_v31 = vpop.f32.mrf.mxu1 }
 0x34d   : > { %v391_v32 = vsel %vm344_vm3, %v385_v31, -inf }
 0x34e   : > { %392 = vmax.xlane.f32.xlu1 %v391_v32  ;;  %v1223_v33 = vpop.f32.mrf.mxu1 }
 0x350   : > { %v388_v34 = vpop.f32.mrf.mxu1 }
 0x352   : > { %v1224_v35 = vpop.f32.mrf.mxu1 }
 0x354   : > { %v506_v36 = vpop.f32.mrf.mxu1 }
 0x355   : > { %v512_v40 = vpack.c.bf16 %v506_v36, %v506_v36 }
 0x356   : > { %v1237_v37 = vpop.f32.mrf.mxu1 }
 0x358   : > { %v509_v38 = vpop.f32.mrf.mxu1 }
 0x35a   : > { %v1238_v39 = vpop.f32.mrf.mxu1 }
 0x35f   : > { %574 = vrot.lane.b32.xlu1 %v512_v40, %s1437_s28 }
 0x3d7   : > { %v393_v41 = vpop.xlane.xlu1 %392 }
 0x3d8   : > { %v394_v42 = vsub.f32 %v385_v31, %v393_v41 }
 0x3da   : > { %v395_v43 = vmul.f32 1.442695, %v394_v42 }
 0x3db   : > { %v575_v44 = vpop.permute.xlu1 %574 }
 0x3dc   : > { %1357 = vpow2.f32 %v395_v43  ;;  %v580_v45 = vsel %vm408_vm2, %v575_v44, 0 }
 0x3dd   : > { %1246 = vmatpush3.bf16.msra.mxu1 %v580_v45 }
 0x3de   : > { %1259 = vmatprep.subr.bf16.mxu1 %v1435_v8 }
 0x3e9   : > { %v1358_v46 = vpop.eup %1357 }
 0x3ea   : > { %v397_v47 = vsel %vm344_vm3, %v1358_v46, 0.0 }
 0x3eb   : > { %398 = vadd.xlane.f32.xlu0 %v397_v47 }
 0x401   : > { %514 = vrot.lane.b32.xlu0 %v512_v40, %s1438_s29 }
 0x474   : > { %v399_v48 = vpop.xlane.xlu0 %398 }
 0x475   : > { %1359 = vrcp.f32 %v399_v48 }
 0x478   : > { %v515_v51 = vpop.permute.xlu0 %514 }
 0x479   : > { %v520_v53 = vsel %vm344_vm3, %v515_v51, 0 }
 0x482   : > { %v1360_v49 = vpop.eup %1359 }
 0x483   : > { %v401_v50 = vmul.f32 %v1360_v49, %v1358_v46 }
 0x485   : > { %v402_v52 = vpack.c.bf16 %v401_v50, %v401_v50 }
 0x487   : > { %1228 = vmatmul.mubr.msk.bf16.vlgmr.msra.gmra.mxu0 %vm344_vm3, %v402_v52 }
 0x488   : > { %1240 = vmatpush3.bf16.xpose.msra.mxu0 %v520_v53  ;;  %1241 = vmatprep.mubr.msk.bf16.mxu0 %vm1436_vm1, %v1435_v8 }
 0x489   : > { %1251 = vmatprep.subr.bf16.mxu0 %v1435_v8 }
 0x48f   : > { %1242 = vmatmul.mubr.msk.bf16.vlgmr.msra.gmra.mxu0 %vm344_vm3, %v512_v40 }
 0x490   : > { %1252 = vmatpush3.bf16.msra.mxu0 %v1349_v54  ;;  %1255 = vmatprep.mubr.msk.bf16.mxu0 %vm1436_vm1, %v1435_v8 }
 0x491   : > { %1253 = vmatprep.subr.bf16.mxu0 %v1435_v8 }
 0x494   : > { %1254 = vmatpush3.bf16.msra.mxu0 %v1350_v55 }
 0x495   : > { %1265 = vmatprep.subr.bf16.mxu0 %v1435_v8 }
 0x497   : > { %1256 = vmatmul.mubr.msk.bf16.vlgmr.msra.gmra.mxu0 %vm249_vm0, %v1557_v19 }
 0x498   : > { %1267 = vmatprep.mubr.msk.bf16.mxu0 %vm1436_vm1, %v1435_v8 }
 0x547   : > { %v446_v56 = vpop.f32.mrf.mxu0 }
 0x548   : > { %v452_v57 = vpack.c.bf16 %v446_v56, %v446_v56 }
 0x549   : > { %v1229_v58 = vpop.f32.mrf.mxu0 }
 0x54a   : > { %454 = vst.msk [vmem:[#allocation2] sm:$0xf] %vm453_vm4, %v452_v57 }
 0x54b   : > { %v449_v59 = vpop.f32.mrf.mxu0 }
 0x54d   : > { %v1230_v60 = vpop.f32.mrf.mxu0 }
 0x54f   : > { %v556_v61 = vpop.f32.mrf.mxu0 }
 0x550   : > { %v562_v62 = vsel %vm344_vm3, %v556_v61, -inf }
 0x551   : > { %563 = vmax.xlane.f32.xlu0 %v562_v62  ;;  %v1243_v63 = vpop.f32.mrf.mxu0 }
 0x553   : > { %v559_v1 = vpop.f32.mrf.mxu0 }
 0x555   : > { %v1244_v2 = vpop.f32.mrf.mxu0 }
 0x557   : > { %v682_v3 = vpop.f32.mrf.mxu0 }
 0x558   : > { %v688_v7 = vpack.c.bf16 %v682_v3, %v682_v3 }
 0x559   : > { %v1257_v4 = vpop.f32.mrf.mxu0 }
 0x55b   : > { %v685_v5 = vpop.f32.mrf.mxu0 }
 0x55d   : > { %v1258_v6 = vpop.f32.mrf.mxu0 }
 0x567   : > { %750 = vrot.lane.b32.xlu0 %v688_v7, %s1437_s28 }
 0x5da   : > { %v564_v9 = vpop.xlane.xlu0 %563 }
 0x5db   : > { %v565_v10 = vsub.f32 %v556_v61, %v564_v9 }
 0x5dd   : > { %v566_v11 = vmul.f32 1.442695, %v565_v10 }
 0x5de   : > { %v751_v12 = vpop.permute.xlu0 %750 }
 0x5df   : > { %1361 = vpow2.f32 %v566_v11  ;;  %v756_v13 = vsel %vm408_vm2, %v751_v12, 0  ;;  %v1353_v11 = vld [vmem:[%s1715_s4 + $0x8] sm:$0xff]   ;;  %v1354_v12 = vld [vmem:[%s1715_s4] sm:$0xff]  }
 0x5e0   : > { %1266 = vmatpush3.bf16.msra.mxu0 %v756_v13 }
 0x5e1   : > { %1279 = vmatprep.subr.bf16.mxu0 %v1435_v8 }
 0x5ec   : > { %v1362_v14 = vpop.eup %1361 }
 0x5ed   : > { %v568_v15 = vsel %vm344_vm3, %v1362_v14, 0.0 }
 0x5ee   : > { %569 = vadd.xlane.f32.xlu1 %v568_v15 }
 0x5ff   : > { %690 = vrot.lane.b32.xlu1 %v688_v7, %s1438_s29 }
 0x677   : > { %v570_v16 = vpop.xlane.xlu1 %569 }
 0x678   : > { %1363 = vrcp.f32 %v570_v16 }
 0x67b   : > { %v691_v20 = vpop.permute.xlu1 %690 }
 0x67c   : > { %v696_v22 = vsel %vm344_vm3, %v691_v20, 0 }
 0x685   : > { %v1364_v17 = vpop.eup %1363 }
 0x686   : > { %v572_v18 = vmul.f32 %v1364_v17, %v1362_v14 }
 0x688   : > { %v573_v21 = vpack.c.bf16 %v572_v18, %v572_v18 }
 0x68a   : > { %1248 = vmatmul.mubr.msk.bf16.vlgmr.msra.gmra.mxu1 %vm344_vm3, %v573_v21 }
 0x68b   : > { %1260 = vmatpush3.bf16.xpose.msra.mxu1 %v696_v22  ;;  %1261 = vmatprep.mubr.msk.bf16.mxu1 %vm1436_vm1, %v1435_v8 }
 0x68c   : > { %1271 = vmatprep.subr.bf16.mxu1 %v1435_v8 }
 0x692   : > { %1262 = vmatmul.mubr.msk.bf16.vlgmr.msra.gmra.mxu1 %vm344_vm3, %v688_v7 }
 0x693   : > { %1272 = vmatpush3.bf16.msra.mxu1 %v1351_v23  ;;  %1275 = vmatprep.mubr.msk.bf16.mxu1 %vm1436_vm1, %v1435_v8 }
 0x694   : > { %1273 = vmatprep.subr.bf16.mxu1 %v1435_v8 }
 0x697   : > { %1274 = vmatpush3.bf16.msra.mxu1 %v1352_v24 }
 0x698   : > { %1285 = vmatprep.subr.bf16.mxu1 %v1435_v8 }
 0x69a   : > { %1276 = vmatmul.mubr.msk.bf16.vlgmr.msra.gmra.mxu1 %vm249_vm0, %v1557_v19 }
 0x69b   : > { %1287 = vmatprep.mubr.msk.bf16.mxu1 %vm1436_vm1, %v1435_v8 }
 0x74a   : > { %v616_v25 = vpop.f32.mrf.mxu1 }
 0x74b   : > { %v1177_v63 = vpack.c.bf16 %v616_v25, %v616_v25 }
 0x74c   : > { %v1249_v26 = vpop.f32.mrf.mxu1 }
 0x74e   : > { %v619_v27 = vpop.f32.mrf.mxu1 }
 0x750   : > { %v1250_v28 = vpop.f32.mrf.mxu1 }
 0x752   : > { %v732_v29 = vpop.f32.mrf.mxu1 }
 0x753   : > { %v738_v30 = vsel %vm344_vm3, %v732_v29, -inf }
 0x754   : > { %739 = vmax.xlane.f32.xlu1 %v738_v30  ;;  %v1263_v31 = vpop.f32.mrf.mxu1 }
 0x756   : > { %v735_v32 = vpop.f32.mrf.mxu1 }
 0x758   : > { %v1264_v33 = vpop.f32.mrf.mxu1 }
 0x75a   : > { %v858_v34 = vpop.f32.mrf.mxu1 }
 0x75b   : > { %v864_v42 = vpack.c.bf16 %v858_v34, %v858_v34 }
 0x75c   : > { %v1277_v35 = vpop.f32.mrf.mxu1 }
 0x75e   : > { %v861_v36 = vpop.f32.mrf.mxu1 }
 0x760   : > { %v1278_v37 = vpop.f32.mrf.mxu1 }
 0x7dd   : > { %v740_v38 = vpop.xlane.xlu1 %739 }
 0x7de   : > { %v741_v19 = vsub.f32 %v732_v29, %v740_v38 }
 0x7e0   : > { %v742_v39 = vmul.f32 1.442695, %v741_v19 }
 0x7e2   : > { %1365 = vpow2.f32 %v742_v39 }
 0x7ef   : > { %v1366_v40 = vpop.eup %1365 }
 0x7f0   : > { %v744_v41 = vsel %vm344_vm3, %v1366_v40, 0.0 }
 0x7f1   : > { %745 = vadd.xlane.f32.xlu0 %v744_v41 }
 0x807   : > { %866 = vrot.lane.b32.xlu0 %v864_v42, %s1438_s29  ;;  %s1440_s29 = smov 16  }
 0x87a   : > { %v746_v43 = vpop.xlane.xlu0 %745 }
 0x87b   : > { %1367 = vrcp.f32 %v746_v43 }
 0x87e   : > { %v867_v46 = vpop.permute.xlu0 %866 }
 0x87f   : > { %v872_v48 = vsel %vm344_vm3, %v867_v46, 0 }
 0x888   : > { %v1368_v44 = vpop.eup %1367 }
 0x889   : > { %v748_v45 = vmul.f32 %v1368_v44, %v1366_v40 }
 0x88b   : > { %v749_v47 = vpack.c.bf16 %v748_v45, %v748_v45 }
 0x88d   : > { %1268 = vmatmul.mubr.msk.bf16.vlgmr.msra.gmra.mxu0 %vm344_vm3, %v749_v47 }
 0x88e   : > { %1280 = vmatpush3.bf16.xpose.msra.mxu0 %v872_v48  ;;  %1281 = vmatprep.mubr.msk.bf16.mxu0 %vm1436_vm1, %v1435_v8 }
 0x88f   : > { %1291 = vmatprep.subr.bf16.mxu0 %v1435_v8 }
 0x895   : > { %1282 = vmatmul.mubr.msk.bf16.vlgmr.msra.gmra.mxu0 %vm344_vm3, %v864_v42 }
 0x896   : > { %1295 = vmatprep.mubr.msk.bf16.mxu0 %vm1436_vm1, %v1435_v8  ;;  %1292 = vmatpush3.bf16.msra.mxu0 %v1353_v11 }
 0x897   : > { %1293 = vmatprep.subr.bf16.mxu0 %v1435_v8  ;;  %v1172_v8 = vld [vmem:[%s1716_s5] ss:$0 sm:$0xff] }
 0x89a   : > { %1294 = vmatpush3.bf16.msra.mxu0 %v1354_v12 }
 0x94d   : > { %v792_v49 = vpop.f32.mrf.mxu0 }
 0x94e   : > { %v1178_v1 = vpack.c.bf16 %v792_v49, %v792_v49 }
 0x94f   : > { %v1269_v50 = vpop.f32.mrf.mxu0 }
 0x951   : > { %v795_v51 = vpop.f32.mrf.mxu0 }
 0x953   : > { %v1270_v52 = vpop.f32.mrf.mxu0 }
 0x955   : > { %v908_v53 = vpop.f32.mrf.mxu0 }
 0x956   : > { %v914_v54 = vsel %vm344_vm3, %v908_v53, -inf }
 0x957   : > { %915 = vmax.xlane.f32.xlu0 %v914_v54  ;;  %v1283_v55 = vpop.f32.mrf.mxu0 }
 0x959   : > { %v911_v56 = vpop.f32.mrf.mxu0 }
 0x95b   : > { %v1284_v57 = vpop.f32.mrf.mxu0 }
 0x9e0   : > { %v916_v58 = vpop.xlane.xlu0 %915 }
 0x9e1   : > { %v917_v59 = vsub.f32 %v908_v53, %v916_v58 }
 0x9e3   : > { %v918_v60 = vmul.f32 1.442695, %v917_v59 }
 0x9e5   : > { %1369 = vpow2.f32 %v918_v60 }
 0x9f2   : > { %v1370_v61 = vpop.eup %1369 }
 0x9f3   : > { %v920_v62 = vsel %vm344_vm3, %v1370_v61, 0.0 }
 0x9f4   : > { %921 = vadd.xlane.f32.xlu1 %v920_v62 }
 0xa05   : > { %926 = vrot.lane.b32.xlu1 %v864_v42, %s1437_s28  ;;  %s1373_s28 = scalar_lea.vmem %s1671_s19, 128 }
 0xa06   : > { %p1374_p11 = scmp.ne.s32.totalorder %s1671_s19, %s1373_s28  ;;  %p1381_p1 = scmp.lt.s32.totalorder %s1379_s11, %s1373_s28 }
 0xa08   : > { %p1375_p12 = pnand %p1374_p11, %p1516_p5  ;;  %p1382_p2 = por %p1381_p1, %p1380_p0 }
 0xa09   : > { %626 = vrot.lane.b32.xlu1 %v1177_v63, %s1439_s26 }
 0xa0a   : > { %p1376_p13 = pneg %p1375_p12 }
 0xa0c   : > { %p1383_p3 = pnand %p1382_p2, %p1376_p13 }
 0xa0d   : > { %802 = vrot.lane.b32.xlu1 %v1178_v1, %s1440_s29  ;;  %s1669_s29 = scalar_lea.hbm %s1717_s6, %s1174_s17 }
 0xa7d   : > { %v922_v2 = vpop.xlane.xlu1 %921 }
 0xa7e   : > { %1371 = vrcp.f32 %v922_v2 }
 0xa81   : > { %v927_v3 = vpop.permute.xlu1 %926 }
 0xa82   : > { %v932_v4 = vsel %vm408_vm2, %v927_v3, 0 }
 0xa83   : > { %1286 = vmatpush3.bf16.msra.mxu1 %v932_v4 }
 0xa85   : > { %v627_v5 = vpop.permute.xlu1 %626 }
 0xa86   : > { %630 = vst.msk [vmem:[#allocation2] sm:$0xf] %vm629_vm5, %v627_v5 }
 0xa89   : > { %v803_v6 = vpop.permute.xlu1 %802 }
 0xa8a   : > { %806 = vst.msk [vmem:[#allocation2] sm:$0xf] %vm805_vm6, %v803_v6 }
 0xa8b   : > { %v1372_v7 = vpop.eup %1371 }
 0xa8c   : > { %v924_v9 = vmul.f32 %v1372_v7, %v1370_v61 }
 0xa8e   : > { %v925_v10 = vpack.c.bf16 %v924_v9, %v924_v9 }
 0xa90   : > { %1288 = vmatmul.mubr.msk.bf16.vlgmr.msra.gmra.mxu1 %vm344_vm3, %v925_v10 }
 0xb50   : > { %v968_v13 = vpop.f32.mrf.mxu1 }
 0xb51   : > { %v1179_v14 = vpack.c.bf16 %v968_v13, %v968_v13 }
 0xb52   : > { %v1289_v15 = vpop.f32.mrf.mxu1 }
 0xb53   : > { %978 = vrot.lane.b32.xlu0 %v1179_v14, %s1441_s12 }
 0xb54   : > { %v971_v16 = vpop.f32.mrf.mxu1 }
 0xb56   : > { %v1290_v17 = vpop.f32.mrf.mxu1 }
 0xbc5   : > { %v979_v18 = vpop.permute.xlu0 %978 }
 0xbc6   : > { %982 = vst.msk [vmem:[#allocation2] sm:$0xf] %vm981_vm7, %v979_v18 }
 0xbcd   : > { %v983_v20 = vld [vmem:[#allocation2] sm:$0xf] }
 0xbce   : > { %1296 = vmatmul.mubr.msk.bf16.vlgmr.msra.gmra.mxu0 %vm249_vm0, %v983_v20 }
 0xc8e   : > { %v1037_v21 = vpop.f32.mrf.mxu0 }
 0xc8f   : > { %v1043_v22 = vadd.f32 %v1037_v21, %v1531_v0 }
 0xc90   : > { %v1297_v23 = vpop.f32.mrf.mxu0 }
 0xc91   : > { %v1051_v24 = vadd.f32 %v1172_v8, %v1043_v22 }
 0xc92   : > { %v1040_v25 = vpop.f32.mrf.mxu0 }
 0xc93   : > { %1052 = vst.msk [vmem:[%s242_s18] sm:$0xff] %vm249_vm0, %v1051_v24 }
 0xc94   : > { %v1298_v26 = vpop.f32.mrf.mxu0 }
 0xc95   : > { %1386 = shalt.err (!%p1383_p3)
}
 0xc96   : > { %s1387_s12 = scalar_lea.hbm %s1669_s29, 128  ;;  %s1391_s15 = scalar_lea.hbm %s1717_s6, 256 }
 0xc97   : > { %p1388_p4 = scmp.ne.s32.totalorder %s1669_s29, %s1387_s12  ;;  %p1392_p9 = scmp.lt.s32.totalorder %s1669_s29, %s1717_s6 }
 0xc98   : > { %p1393_p10 = scmp.lt.s32.totalorder %s1391_s15, %s1387_s12 }
 0xc99   : > { %p1389_p7 = pnand %p1388_p4, %p1516_p5 }
 0xc9a   : > { %p1394_p11 = por %p1393_p10, %p1392_p9 }
 0xc9b   : > { %p1390_p8 = pneg %p1389_p7 }
 0xc9d   : > { %p1395_p12 = pnand %p1394_p11, %p1390_p8 }
 0xc9f   : > { %1398 = shalt.err (!%p1395_p12)
}
 0xca0   : > { %1299 = dma.vmem_to_hbm [thread:$0]  (%p1516_p5), %s1671_s19, 128, %s1669_s29, %s1054_s25  }
 0xca1 PF: > { %p1305_p13 = scmp.ge.s32.totalorder %s1433_s24, 2  ;;  %s1079_s18 = sand.u32 1, %s1421_s21  }
 0xca2   : > { %s1080_s20 = scalar_lea.sflag [#allocation4], %s1079_s18 }
 0xca3   : > { %p1302_p0 = pnand %p1305_p13, %p1520_p6 }
 0xca5   : > { %p1303_p1 = pneg %p1302_p0 }
 0xca7   : > { %1416 = dma.done.wait (%p1303_p1), %s1080_s20, 128  }
 0xca8   : > { %1418 = vsyncadd (%p1303_p1), %s1080_s20, 4294967168  ;;  %p16_p2 = scmp.ge.s32.totalorder %s1503_s27, 4   ;;  %s1720_s21 = smov %s1425_s22 }
 0xca9   : > { %s1721_s22 = smov %s1429_s23  ;;  %s1722_s23 = smov %s1514_s30 }
 0xcaa   : > { %s1723_s24 = smov %s1503_s27  ;;  %18 = sbr.rel (!%p16_p2) target bundleno = 3 (0x3), region = 82 }
 0xcaf   :  { %1085 = vsyncpa [#allocation4], 1 }
 0xcb0   :  { %1087 = vsyncpa [#allocation4 + $0x1], 1 }

// kernel: tpu_custom_call.1
= control target key start
LH: loop header
LB: loop body
LE: loop exit
PB: predicated region body
PF: predicated region fallthrough
CT: control target
= control target key end

     0   :  { %11 = vsyncpa [#allocation4], 0  ;;  %s1711_s0 = inlined_call_operand.vmem [shape: f32[2,8,32], index: 0, kind: input, shape index: {}]   ;;  %s1712_s1 = inlined_call_operand.vmem [shape: f32[1,32], index: 1, kind: input, shape index: {}]   ;;  %s1713_s2 = inlined_call_operand.vmem [shape: f32[1,32], index: 2, kind: input, shape index: {}]   ;;  %s1714_s3 = inlined_call_operand.vmem [shape: bf16[4,32,24], index: 3, kind: input, shape index: {}]   ;;  %s1715_s4 = inlined_call_operand.vmem [shape: bf16[32,32], index: 4, kind: input, shape index: {}]   ;;  %s1716_s5 = inlined_call_operand.vmem [shape: f32[1,32], index: 5, kind: input, shape index: {}]   ;;  %s1717_s6 = inlined_call_operand.hbm [shape: f32[2,8,32], index: 6, kind: output, shape index: {}]  }
   0x1   :  { %13 = vsyncpa [#allocation4 + $0x1], 0  ;;  %s1478_s21 = smov 0   ;;  %s1480_s22 = smov 0  }
   0x2   :  { %s1482_s23 = smov 0   ;;  %s1484_s24 = smov 0  }
   0x3 LB: > { %s1499_s25 = sadd.s32 4294967295, %s1433_s24   ;;  %s1126_s26 = sadd.s32 4294967294, %s1433_s24   ;;  %s1433_s24 = sphi %s1484_s24, %s1723_s24   ;;  %s1429_s23 = sphi %s1482_s23, %s1722_s23   ;;  %s1425_s22 = sphi %s1480_s22, %s1721_s22   ;;  %s1421_s21 = sphi %s1478_s21, %s1720_s21  }
   0x4   : > { %s1503_s27 = sadd.s32 1, %s1433_s24   ;;  %s157_s28 = sadd.s32 1, %s1429_s23 }
   0x5   : > { %s154_s29 = ssub.s32 %s1433_s24, %s1503_s27  ;;  %p167_p0 = scmp.ne.s32.totalorder %s1429_s23, %s1425_s22 }
   0x6   : > { %p155_p1 = scmp.eq.s32.totalorder %s154_s29, 0  ;;  %p168_p2 = scmp.eq.s32.totalorder %s1499_s25, 1 }
   0x7   : > { %p173_p3 = scmp.ne.s32.totalorder %s1425_s22, %s1421_s21  ;;  %p174_p4 = scmp.eq.s32.totalorder %s1126_s26, 1 }
   0x8   : > { %s1514_s30 = scalar_select %p155_p1, %s1429_s23, %s157_s28  }
   0x9   : > { %p1516_p5 = por %p168_p2, %p167_p0  ;;  %p1520_p6 = por %p174_p4, %p173_p3 }
   0xa   : > { %p1129_p7 = scmp.ge.s32.totalorder %s1433_s24, 1  ;;  %p214_p8 = scmp.lt.s32.totalorder %s1433_s24, 3 }
   0xc   : > { %p215_p9 = pnand %p1129_p7, %p214_p8 }
   0xd   : > { %p243_p10 = scmp.lt.s32.totalorder (!%p215_p9), %s1499_s25, 1  ;;  %s1437_s28 = smov (!%p215_p9), 112  }
   0xe   : > { %218 = sbr.rel (%p215_p9) target bundleno = 3233 (0xca1), region = 44  ;;  %s1438_s29 = smov (!%p215_p9), 120  }
   0xf   : > { %s1439_s26 = smov (!%p215_p9), 8   ;;  %s1441_s12 = smov (!%p215_p9), 24  }
  0x10   : > { %s1174_s17 = sshll.u32 (!%p215_p9), %s1499_s25, 7 }
  0x13   : > { %s244_s9 = scalar_select %p243_p10, %s1499_s25, 1  ;;  %vm249_vm0 = vcmask 261120   ;;  %v1345_v7 = vld [vmem:[%s1714_s3 + $0x8] sm:$0xff]   ;;  %v1435_v8 = vmov 0.0   ;;  %vm1436_vm1 = vmmov 0   ;;  %v1346_v9 = vld [vmem:[%s1714_s3] sm:$0xff]  }
  0x14   : > { %1211 = vmatprep.subr.bf16.mxu0 %v1435_v8  ;;  %1215 = vmatprep.mubr.msk.bf16.mxu0 %vm1436_vm1, %v1435_v8  ;;  %v1132_v14 = vld [vmem:[%s1712_s1] ss:$0 sm:$0xff]  ;;  %vm408_vm2 = vcmask 1043456   ;;  %vm344_vm3 = vcmask 64512   ;;  %v1347_v29 = vld [vmem:[%s1714_s3 + $0x18] sm:$0xff]   ;;  %v1348_v30 = vld [vmem:[%s1714_s3 + $0x10] sm:$0xff]  }
  0x15   : > { %s1131_s10 = sshll.u32 %s244_s9, 3  ;;  %1212 = vmatpush3.bf16.msra.mxu0 %v1345_v7  ;;  %1219 = vmatprep.subr.bf16.mxu1 %v1435_v8  ;;  %v1133_v16 = vld [vmem:[%s1713_s2] ss:$0 sm:$0xff]  ;;  %v1349_v54 = vld [vmem:[%s1714_s3 + $0x28] sm:$0xff]   ;;  %vm453_vm4 = vcmask 60416   ;;  %vm629_vm5 = vcmask 126016  }
  0x16   : > { %s246_s13 = scalar_lea.vmem %s1711_s0, %s1131_s10  ;;  %1213 = vmatprep.subr.bf16.mxu0 %v1435_v8  ;;  %1221 = vmatprep.mubr.msk.bf16.mxu1 %vm1436_vm1, %v1435_v8  ;;  %v1350_v55 = vld [vmem:[%s1714_s3 + $0x20] sm:$0xff]   ;;  %vm805_vm6 = vcmask 191616   ;;  %vm981_vm7 = vcmask 257216   ;;  %s1442_s9 = smov [#allocation3]  }
  0x17   : > { %v1531_v0 = vld [vmem:[%s246_s13] sm:$0xff]  ;;  %s240_s13 = sand.u32 1, %s1425_s22   ;;  %s1377_s10 = sshll.u32 %s1442_s9, 4  ;;  %s1378_s10 = int_to_ptr.vmem [resolvable:$false] %s1377_s10 }
  0x18   : > { %v250_v1 = vsel %vm249_vm0, %v1531_v0, 0.0  ;;  %s1130_s14 = sshll.u32 %s240_s13, 3  ;;  %s1054_s25 = scalar_lea.sflag [#allocation4], %s240_s13 }
  0x19   : > { %251 = vadd.xlane.f32.xlu0 %v250_v1  ;;  %1214 = vmatpush3.bf16.msra.mxu0 %v1346_v9  ;;  %s242_s18 = scalar_lea.vmem [#allocation3], %s1130_s14  ;;  %s1379_s11 = scalar_lea.vmem %s1378_s10, 256 }
  0x1a   : > { %1225 = vmatprep.subr.bf16.mxu0 %v1435_v8  ;;  %s1067_s19 = sshll.u32 %s242_s18, 4  ;;  %s1671_s19 = int_to_ptr.vmem [resolvable:$true] %s1067_s19 }
  0x1b   : > { %p1380_p0 = scmp.lt.s32.totalorder %s1671_s19, %s1378_s10 }
  0xa2   : > { %v252_v2 = vpop.xlane.xlu0 %251 }
  0xa3   : > { %v254_v3 = vmul.f32 0.03125, %v252_v2 }
  0xa5   : > { %v255_v4 = vsub.f32 %v1531_v0, %v254_v3 }
  0xa7   : > { %v256_v5 = vmul.f32 %v255_v4, %v255_v4 }
  0xa9   : > { %v257_v6 = vsel %vm249_vm0, %v256_v5, 0.0 }
  0xaa   : > { %258 = vadd.xlane.f32.xlu0 %v257_v6 }
 0x133   : > { %v259_v10 = vpop.xlane.xlu0 %258 }
 0x134   : > { %v260_v11 = vmul.f32 0.03125, %v259_v10 }
 0x136   : > { %v261_v12 = vadd.f32 1e-05, %v260_v11 }
 0x138   : > { %1355 = vrsqrt.f32 %v261_v12 }
 0x145   : > { %v1356_v13 = vpop.eup %1355 }
 0x146   : > { %v263_v15 = vmul.f32 %v1356_v13, %v255_v4 }
 0x148   : > { %v271_v17 = vmul.f32 %v1132_v14, %v263_v15 }
 0x14a   : > { %v279_v18 = vadd.f32 %v1133_v16, %v271_v17 }
 0x14c   : > { %v1557_v19 = vpack.c.bf16 %v279_v18, %v279_v18 }
 0x14e   : > { %1216 = vmatmul.mubr.msk.bf16.vlgmr.msra.gmra.mxu0 %vm249_vm0, %v1557_v19 }
 0x14f   : > { %1227 = vmatprep.mubr.msk.bf16.mxu0 %vm1436_vm1, %v1435_v8 }
 0x20e   : > { %v334_v20 = vpop.f32.mrf.mxu0 }
 0x20f   : > { %v340_v21 = vpack.c.bf16 %v334_v20, %v334_v20 }
 0x210   : > { %v1217_v22 = vpop.f32.mrf.mxu0 }
 0x211   : > { %403 = vrot.lane.b32.xlu0 %v340_v21, %s1437_s28  ;;  %342 = vrot.lane.b32.xlu1 %v340_v21, %s1438_s29 }
 0x212   : > { %v337_v23 = vpop.f32.mrf.mxu0 }
 0x213   : > { %v1351_v23 = vld [vmem:[%s1714_s3 + $0x38] sm:$0xff]  }
 0x214   : > { %v1218_v24 = vpop.f32.mrf.mxu0 }
 0x215   : > { %v1352_v24 = vld [vmem:[%s1714_s3 + $0x30] sm:$0xff]  }
 0x283   : > { %v404_v25 = vpop.permute.xlu0 %403  ;;  %v343_v26 = vpop.permute.xlu1 %342 }
 0x284   : > { %v410_v27 = vsel %vm408_vm2, %v404_v25, 0  ;;  %v349_v28 = vsel %vm344_vm3, %v343_v26, 0 }
 0x285   : > { %1220 = vmatpush3.bf16.xpose.msra.mxu1 %v349_v28  ;;  %1226 = vmatpush3.bf16.msra.mxu0 %v410_v27 }
 0x286   : > { %1231 = vmatprep.subr.bf16.mxu1 %v1435_v8  ;;  %1239 = vmatprep.subr.bf16.mxu0 %v1435_v8 }
 0x28c   : > { %1222 = vmatmul.mubr.msk.bf16.vlgmr.msra.gmra.mxu1 %vm344_vm3, %v340_v21 }
 0x28d   : > { %1232 = vmatpush3.bf16.msra.mxu1 %v1347_v29  ;;  %1235 = vmatprep.mubr.msk.bf16.mxu1 %vm1436_vm1, %v1435_v8 }
 0x28e   : > { %1233 = vmatprep.subr.bf16.mxu1 %v1435_v8 }
 0x291   : > { %1234 = vmatpush3.bf16.msra.mxu1 %v1348_v30 }
 0x292   : > { %1245 = vmatprep.subr.bf16.mxu1 %v1435_v8 }
 0x294   : > { %1236 = vmatmul.mubr.msk.bf16.vlgmr.msra.gmra.mxu1 %vm249_vm0, %v1557_v19 }
 0x295   : > { %1247 = vmatprep.mubr.msk.bf16.mxu1 %vm1436_vm1, %v1435_v8 }
 0x34c   : > { %v385_v31 = vpop.f32.mrf.mxu1 }
 0x34d   : > { %v391_v32 = vsel %vm344_vm3, %v385_v31, -inf }
 0x34e   : > { %392 = vmax.xlane.f32.xlu1 %v391_v32  ;;  %v1223_v33 = vpop.f32.mrf.mxu1 }
 0x350   : > { %v388_v34 = vpop.f32.mrf.mxu1 }
 0x352   : > { %v1224_v35 = vpop.f32.mrf.mxu1 }
 0x354   : > { %v506_v36 = vpop.f32.mrf.mxu1 }
 0x355   : > { %v512_v40 = vpack.c.bf16 %v506_v36, %v506_v36 }
 0x356   : > { %v1237_v37 = vpop.f32.mrf.mxu1 }
 0x358   : > { %v509_v38 = vpop.f32.mrf.mxu1 }
 0x35a   : > { %v1238_v39 = vpop.f32.mrf.mxu1 }
 0x35f   : > { %574 = vrot.lane.b32.xlu1 %v512_v40, %s1437_s28 }
 0x3d7   : > { %v393_v41 = vpop.xlane.xlu1 %392 }
 0x3d8   : > { %v394_v42 = vsub.f32 %v385_v31, %v393_v41 }
 0x3da   : > { %v395_v43 = vmul.f32 1.442695, %v394_v42 }
 0x3db   : > { %v575_v44 = vpop.permute.xlu1 %574 }
 0x3dc   : > { %1357 = vpow2.f32 %v395_v43  ;;  %v580_v45 = vsel %vm408_vm2, %v575_v44, 0 }
 0x3dd   : > { %1246 = vmatpush3.bf16.msra.mxu1 %v580_v45 }
 0x3de   : > { %1259 = vmatprep.subr.bf16.mxu1 %v1435_v8 }
 0x3e9   : > { %v1358_v46 = vpop.eup %1357 }
 0x3ea   : > { %v397_v47 = vsel %vm344_vm3, %v1358_v46, 0.0 }
 0x3eb   : > { %398 = vadd.xlane.f32.xlu0 %v397_v47 }
 0x401   : > { %514 = vrot.lane.b32.xlu0 %v512_v40, %s1438_s29 }
 0x474   : > { %v399_v48 = vpop.xlane.xlu0 %398 }
 0x475   : > { %1359 = vrcp.f32 %v399_v48 }
 0x478   : > { %v515_v51 = vpop.permute.xlu0 %514 }
 0x479   : > { %v520_v53 = vsel %vm344_vm3, %v515_v51, 0 }
 0x482   : > { %v1360_v49 = vpop.eup %1359 }
 0x483   : > { %v401_v50 = vmul.f32 %v1360_v49, %v1358_v46 }
 0x485   : > { %v402_v52 = vpack.c.bf16 %v401_v50, %v401_v50 }
 0x487   : > { %1228 = vmatmul.mubr.msk.bf16.vlgmr.msra.gmra.mxu0 %vm344_vm3, %v402_v52 }
 0x488   : > { %1240 = vmatpush3.bf16.xpose.msra.mxu0 %v520_v53  ;;  %1241 = vmatprep.mubr.msk.bf16.mxu0 %vm1436_vm1, %v1435_v8 }
 0x489   : > { %1251 = vmatprep.subr.bf16.mxu0 %v1435_v8 }
 0x48f   : > { %1242 = vmatmul.mubr.msk.bf16.vlgmr.msra.gmra.mxu0 %vm344_vm3, %v512_v40 }
 0x490   : > { %1252 = vmatpush3.bf16.msra.mxu0 %v1349_v54  ;;  %1255 = vmatprep.mubr.msk.bf16.mxu0 %vm1436_vm1, %v1435_v8 }
 0x491   : > { %1253 = vmatprep.subr.bf16.mxu0 %v1435_v8 }
 0x494   : > { %1254 = vmatpush3.bf16.msra.mxu0 %v1350_v55 }
 0x495   : > { %1265 = vmatprep.subr.bf16.mxu0 %v1435_v8 }
 0x497   : > { %1256 = vmatmul.mubr.msk.bf16.vlgmr.msra.gmra.mxu0 %vm249_vm0, %v1557_v19 }
 0x498   : > { %1267 = vmatprep.mubr.msk.bf16.mxu0 %vm1436_vm1, %v1435_v8 }
 0x547   : > { %v446_v56 = vpop.f32.mrf.mxu0 }
 0x548   : > { %v452_v57 = vpack.c.bf16 %v446_v56, %v446_v56 }
 0x549   : > { %v1229_v58 = vpop.f32.mrf.mxu0 }
 0x54a   : > { %454 = vst.msk [vmem:[#allocation2] sm:$0xf] %vm453_vm4, %v452_v57 }
 0x54b   : > { %v449_v59 = vpop.f32.mrf.mxu0 }
 0x54d   : > { %v1230_v60 = vpop.f32.mrf.mxu0 }
 0x54f   : > { %v556_v61 = vpop.f32.mrf.mxu0 }
 0x550   : > { %v562_v62 = vsel %vm344_vm3, %v556_v61, -inf }
 0x551   : > { %563 = vmax.xlane.f32.xlu0 %v562_v62  ;;  %v1243_v63 = vpop.f32.mrf.mxu0 }
 0x553   : > { %v559_v1 = vpop.f32.mrf.mxu0 }
 0x555   : > { %v1244_v2 = vpop.f32.mrf.mxu0 }
 0x557   : > { %v682_v3 = vpop.f32.mrf.mxu0 }
 0x558   : > { %v688_v7 = vpack.c.bf16 %v682_v3, %v682_v3 }
 0x559   : > { %v1257_v4 = vpop.f32.mrf.mxu0 }
 0x55b   : > { %v685_v5 = vpop.f32.mrf.mxu0 }
 0x55d   : > { %v1258_v6 = vpop.f32.mrf.mxu0 }
 0x567   : > { %750 = vrot.lane.b32.xlu0 %v688_v7, %s1437_s28 }
 0x5da   : > { %v564_v9 = vpop.xlane.xlu0 %563 }
 0x5db   : > { %v565_v10 = vsub.f32 %v556_v61, %v564_v9 }
 0x5dd   : > { %v566_v11 = vmul.f32 1.442695, %v565_v10 }
 0x5de   : > { %v751_v12 = vpop.permute.xlu0 %750 }
 0x5df   : > { %1361 = vpow2.f32 %v566_v11  ;;  %v756_v13 = vsel %vm408_vm2, %v751_v12, 0  ;;  %v1353_v11 = vld [vmem:[%s1715_s4 + $0x8] sm:$0xff]   ;;  %v1354_v12 = vld [vmem:[%s1715_s4] sm:$0xff]  }
 0x5e0   : > { %1266 = vmatpush3.bf16.msra.mxu0 %v756_v13 }
 0x5e1   : > { %1279 = vmatprep.subr.bf16.mxu0 %v1435_v8 }
 0x5ec   : > { %v1362_v14 = vpop.eup %1361 }
 0x5ed   : > { %v568_v15 = vsel %vm344_vm3, %v1362_v14, 0.0 }
 0x5ee   : > { %569 = vadd.xlane.f32.xlu1 %v568_v15 }
 0x5ff   : > { %690 = vrot.lane.b32.xlu1 %v688_v7, %s1438_s29 }
 0x677   : > { %v570_v16 = vpop.xlane.xlu1 %569 }
 0x678   : > { %1363 = vrcp.f32 %v570_v16 }
 0x67b   : > { %v691_v20 = vpop.permute.xlu1 %690 }
 0x67c   : > { %v696_v22 = vsel %vm344_vm3, %v691_v20, 0 }
 0x685   : > { %v1364_v17 = vpop.eup %1363 }
 0x686   : > { %v572_v18 = vmul.f32 %v1364_v17, %v1362_v14 }
 0x688   : > { %v573_v21 = vpack.c.bf16 %v572_v18, %v572_v18 }
 0x68a   : > { %1248 = vmatmul.mubr.msk.bf16.vlgmr.msra.gmra.mxu1 %vm344_vm3, %v573_v21 }
 0x68b   : > { %1260 = vmatpush3.bf16.xpose.msra.mxu1 %v696_v22  ;;  %1261 = vmatprep.mubr.msk.bf16.mxu1 %vm1436_vm1, %v1435_v8 }
 0x68c   : > { %1271 = vmatprep.subr.bf16.mxu1 %v1435_v8 }
 0x692   : > { %1262 = vmatmul.mubr.msk.bf16.vlgmr.msra.gmra.mxu1 %vm344_vm3, %v688_v7 }
 0x693   : > { %1272 = vmatpush3.bf16.msra.mxu1 %v1351_v23  ;;  %1275 = vmatprep.mubr.msk.bf16.mxu1 %vm1436_vm1, %v1435_v8 }
 0x694   : > { %1273 = vmatprep.subr.bf16.mxu1 %v1435_v8 }
 0x697   : > { %1274 = vmatpush3.bf16.msra.mxu1 %v1352_v24 }
 0x698   : > { %1285 = vmatprep.subr.bf16.mxu1 %v1435_v8 }
 0x69a   : > { %1276 = vmatmul.mubr.msk.bf16.vlgmr.msra.gmra.mxu1 %vm249_vm0, %v1557_v19 }
 0x69b   : > { %1287 = vmatprep.mubr.msk.bf16.mxu1 %vm1436_vm1, %v1435_v8 }
 0x74a   : > { %v616_v25 = vpop.f32.mrf.mxu1 }
 0x74b   : > { %v1177_v63 = vpack.c.bf16 %v616_v25, %v616_v25 }
 0x74c   : > { %v1249_v26 = vpop.f32.mrf.mxu1 }
 0x74e   : > { %v619_v27 = vpop.f32.mrf.mxu1 }
 0x750   : > { %v1250_v28 = vpop.f32.mrf.mxu1 }
 0x752   : > { %v732_v29 = vpop.f32.mrf.mxu1 }
 0x753   : > { %v738_v30 = vsel %vm344_vm3, %v732_v29, -inf }
 0x754   : > { %739 = vmax.xlane.f32.xlu1 %v738_v30  ;;  %v1263_v31 = vpop.f32.mrf.mxu1 }
 0x756   : > { %v735_v32 = vpop.f32.mrf.mxu1 }
 0x758   : > { %v1264_v33 = vpop.f32.mrf.mxu1 }
 0x75a   : > { %v858_v34 = vpop.f32.mrf.mxu1 }
 0x75b   : > { %v864_v42 = vpack.c.bf16 %v858_v34, %v858_v34 }
 0x75c   : > { %v1277_v35 = vpop.f32.mrf.mxu1 }
 0x75e   : > { %v861_v36 = vpop.f32.mrf.mxu1 }
 0x760   : > { %v1278_v37 = vpop.f32.mrf.mxu1 }
 0x7dd   : > { %v740_v38 = vpop.xlane.xlu1 %739 }
 0x7de   : > { %v741_v19 = vsub.f32 %v732_v29, %v740_v38 }
 0x7e0   : > { %v742_v39 = vmul.f32 1.442695, %v741_v19 }
 0x7e2   : > { %1365 = vpow2.f32 %v742_v39 }
 0x7ef   : > { %v1366_v40 = vpop.eup %1365 }
 0x7f0   : > { %v744_v41 = vsel %vm344_vm3, %v1366_v40, 0.0 }
 0x7f1   : > { %745 = vadd.xlane.f32.xlu0 %v744_v41 }
 0x807   : > { %866 = vrot.lane.b32.xlu0 %v864_v42, %s1438_s29  ;;  %s1440_s29 = smov 16  }
 0x87a   : > { %v746_v43 = vpop.xlane.xlu0 %745 }
 0x87b   : > { %1367 = vrcp.f32 %v746_v43 }
 0x87e   : > { %v867_v46 = vpop.permute.xlu0 %866 }
 0x87f   : > { %v872_v48 = vsel %vm344_vm3, %v867_v46, 0 }
 0x888   : > { %v1368_v44 = vpop.eup %1367 }
 0x889   : > { %v748_v45 = vmul.f32 %v1368_v44, %v1366_v40 }
 0x88b   : > { %v749_v47 = vpack.c.bf16 %v748_v45, %v748_v45 }
 0x88d   : > { %1268 = vmatmul.mubr.msk.bf16.vlgmr.msra.gmra.mxu0 %vm344_vm3, %v749_v47 }
 0x88e   : > { %1280 = vmatpush3.bf16.xpose.msra.mxu0 %v872_v48  ;;  %1281 = vmatprep.mubr.msk.bf16.mxu0 %vm1436_vm1, %v1435_v8 }
 0x88f   : > { %1291 = vmatprep.subr.bf16.mxu0 %v1435_v8 }
 0x895   : > { %1282 = vmatmul.mubr.msk.bf16.vlgmr.msra.gmra.mxu0 %vm344_vm3, %v864_v42 }
 0x896   : > { %1295 = vmatprep.mubr.msk.bf16.mxu0 %vm1436_vm1, %v1435_v8  ;;  %1292 = vmatpush3.bf16.msra.mxu0 %v1353_v11 }
 0x897   : > { %1293 = vmatprep.subr.bf16.mxu0 %v1435_v8  ;;  %v1172_v8 = vld [vmem:[%s1716_s5] ss:$0 sm:$0xff] }
 0x89a   : > { %1294 = vmatpush3.bf16.msra.mxu0 %v1354_v12 }
 0x94d   : > { %v792_v49 = vpop.f32.mrf.mxu0 }
 0x94e   : > { %v1178_v1 = vpack.c.bf16 %v792_v49, %v792_v49 }
 0x94f   : > { %v1269_v50 = vpop.f32.mrf.mxu0 }
 0x951   : > { %v795_v51 = vpop.f32.mrf.mxu0 }
 0x953   : > { %v1270_v52 = vpop.f32.mrf.mxu0 }
 0x955   : > { %v908_v53 = vpop.f32.mrf.mxu0 }
 0x956   : > { %v914_v54 = vsel %vm344_vm3, %v908_v53, -inf }
 0x957   : > { %915 = vmax.xlane.f32.xlu0 %v914_v54  ;;  %v1283_v55 = vpop.f32.mrf.mxu0 }
 0x959   : > { %v911_v56 = vpop.f32.mrf.mxu0 }
 0x95b   : > { %v1284_v57 = vpop.f32.mrf.mxu0 }
 0x9e0   : > { %v916_v58 = vpop.xlane.xlu0 %915 }
 0x9e1   : > { %v917_v59 = vsub.f32 %v908_v53, %v916_v58 }
 0x9e3   : > { %v918_v60 = vmul.f32 1.442695, %v917_v59 }
 0x9e5   : > { %1369 = vpow2.f32 %v918_v60 }
 0x9f2   : > { %v1370_v61 = vpop.eup %1369 }
 0x9f3   : > { %v920_v62 = vsel %vm344_vm3, %v1370_v61, 0.0 }
 0x9f4   : > { %921 = vadd.xlane.f32.xlu1 %v920_v62 }
 0xa05   : > { %926 = vrot.lane.b32.xlu1 %v864_v42, %s1437_s28  ;;  %s1373_s28 = scalar_lea.vmem %s1671_s19, 128 }
 0xa06   : > { %p1374_p11 = scmp.ne.s32.totalorder %s1671_s19, %s1373_s28  ;;  %p1381_p1 = scmp.lt.s32.totalorder %s1379_s11, %s1373_s28 }
 0xa08   : > { %p1375_p12 = pnand %p1374_p11, %p1516_p5  ;;  %p1382_p2 = por %p1381_p1, %p1380_p0 }
 0xa09   : > { %626 = vrot.lane.b32.xlu1 %v1177_v63, %s1439_s26 }
 0xa0a   : > { %p1376_p13 = pneg %p1375_p12 }
 0xa0c   : > { %p1383_p3 = pnand %p1382_p2, %p1376_p13 }
 0xa0d   : > { %802 = vrot.lane.b32.xlu1 %v1178_v1, %s1440_s29  ;;  %s1669_s29 = scalar_lea.hbm %s1717_s6, %s1174_s17 }
 0xa7d   : > { %v922_v2 = vpop.xlane.xlu1 %921 }
 0xa7e   : > { %1371 = vrcp.f32 %v922_v2 }
 0xa81   : > { %v927_v3 = vpop.permute.xlu1 %926 }
 0xa82   : > { %v932_v4 = vsel %vm408_vm2, %v927_v3, 0 }
 0xa83   : > { %1286 = vmatpush3.bf16.msra.mxu1 %v932_v4 }
 0xa85   : > { %v627_v5 = vpop.permute.xlu1 %626 }
 0xa86   : > { %630 = vst.msk [vmem:[#allocation2] sm:$0xf] %vm629_vm5, %v627_v5 }
 0xa89   : > { %v803_v6 = vpop.permute.xlu1 %802 }
 0xa8a   : > { %806 = vst.msk [vmem:[#allocation2] sm:$0xf] %vm805_vm6, %v803_v6 }
 0xa8b   : > { %v1372_v7 = vpop.eup %1371 }
 0xa8c   : > { %v924_v9 = vmul.f32 %v1372_v7, %v1370_v61 }
 0xa8e   : > { %v925_v10 = vpack.c.bf16 %v924_v9, %v924_v9 }
 0xa90   : > { %1288 = vmatmul.mubr.msk.bf16.vlgmr.msra.gmra.mxu1 %vm344_vm3, %v925_v10 }
 0xb50   : > { %v968_v13 = vpop.f32.mrf.mxu1 }
 0xb51   : > { %v1179_v14 = vpack.c.bf16 %v968_v13, %v968_v13 }
 0xb52   : > { %v1289_v15 = vpop.f32.mrf.mxu1 }
 0xb53   : > { %978 = vrot.lane.b32.xlu0 %v1179_v14, %s1441_s12 }
 0xb54   : > { %v971_v16 = vpop.f32.mrf.mxu1 }
 0xb56   : > { %v1290_v17 = vpop.f32.mrf.mxu1 }
 0xbc5   : > { %v979_v18 = vpop.permute.xlu0 %978 }
 0xbc6   : > { %982 = vst.msk [vmem:[#allocation2] sm:$0xf] %vm981_vm7, %v979_v18 }
 0xbcd   : > { %v983_v20 = vld [vmem:[#allocation2] sm:$0xf] }
 0xbce   : > { %1296 = vmatmul.mubr.msk.bf16.vlgmr.msra.gmra.mxu0 %vm249_vm0, %v983_v20 }
 0xc8e   : > { %v1037_v21 = vpop.f32.mrf.mxu0 }
 0xc8f   : > { %v1043_v22 = vadd.f32 %v1037_v21, %v1531_v0 }
 0xc90   : > { %v1297_v23 = vpop.f32.mrf.mxu0 }
 0xc91   : > { %v1051_v24 = vadd.f32 %v1172_v8, %v1043_v22 }
 0xc92   : > { %v1040_v25 = vpop.f32.mrf.mxu0 }
 0xc93   : > { %1052 = vst.msk [vmem:[%s242_s18] sm:$0xff] %vm249_vm0, %v1051_v24 }
 0xc94   : > { %v1298_v26 = vpop.f32.mrf.mxu0 }
 0xc95   : > { %1386 = shalt.err (!%p1383_p3)
}
 0xc96   : > { %s1387_s12 = scalar_lea.hbm %s1669_s29, 128  ;;  %s1391_s15 = scalar_lea.hbm %s1717_s6, 256 }
 0xc97   : > { %p1388_p4 = scmp.ne.s32.totalorder %s1669_s29, %s1387_s12  ;;  %p1392_p9 = scmp.lt.s32.totalorder %s1669_s29, %s1717_s6 }
 0xc98   : > { %p1393_p10 = scmp.lt.s32.totalorder %s1391_s15, %s1387_s12 }
 0xc99   : > { %p1389_p7 = pnand %p1388_p4, %p1516_p5 }
 0xc9a   : > { %p1394_p11 = por %p1393_p10, %p1392_p9 }
 0xc9b   : > { %p1390_p8 = pneg %p1389_p7 }
 0xc9d   : > { %p1395_p12 = pnand %p1394_p11, %p1390_p8 }
 0xc9f   : > { %1398 = shalt.err (!%p1395_p12)
}
 0xca0   : > { %1299 = dma.vmem_to_hbm [thread:$0]  (%p1516_p5), %s1671_s19, 128, %s1669_s29, %s1054_s25  }
 0xca1 PF: > { %p1305_p13 = scmp.ge.s32.totalorder %s1433_s24, 2  ;;  %s1079_s18 = sand.u32 1, %s1421_s21  }
 0xca2   : > { %s1080_s20 = scalar_lea.sflag [#allocation4], %s1079_s18 }
 0xca3   : > { %p1302_p0 = pnand %p1305_p13, %p1520_p6 }
 0xca5   : > { %p1303_p1 = pneg %p1302_p0 }
 0xca7   : > { %1416 = dma.done.wait (%p1303_p1), %s1080_s20, 128  }
 0xca8   : > { %1418 = vsyncadd (%p1303_p1), %s1080_s20, 4294967168  ;;  %p16_p2 = scmp.ge.s32.totalorder %s1503_s27, 4   ;;  %s1720_s21 = smov %s1425_s22 }
 0xca9   : > { %s1721_s22 = smov %s1429_s23  ;;  %s1722_s23 = smov %s1514_s30 }
 0xcaa   : > { %s1723_s24 = smov %s1503_s27  ;;  %18 = sbr.rel (!%p16_p2) target bundleno = 3 (0x3), region = 82 }
 0xcaf   :  { %1085 = vsyncpa [#allocation4], 1 }
 0xcb0   :  { %1087 = vsyncpa [#allocation4 + $0x1], 1 }

</bundles_post_ra>
